<compile_context>
chip_gen: v7x
topology: tpu7x:2x2x1
jax: 0.10.0
libtpu: 0.0.40
codegen_flags: <defaults>
</compile_context>

<pallas_src>
import jax
import jax.numpy as jnp
from jax import lax
from jax.experimental import pallas as pl
from jax.experimental.pallas import tpu as pltpu

HIDDEN = 256
NUM_CLASSES = 7
OUT_PAD = 128        # lane-dense padded logits width (multiple of 128)
VOCAB = 1024         # synthetic vocab size
VC = 128             # vocab chunk (lanes); per-chunk counts stay vreg-resident


def _round_up(x, m):
    return (x + m - 1) // m * m


# ---------------------------------------------------------------------------
# Fused kernel:
#   acc = sum_chunks counts_chunk @ T1[chunk]     (one-hot counts on the MXU,
#                                                  T1 = emb_table @ W1 folded)
#   h   = relu(acc * (1/S) + b1)                  (dropout p=0.0 -> identity)
#   y   = relu(h @ W2pad + b2pad)                 (lane-dense 128-wide logits)
# ---------------------------------------------------------------------------
def _fused_kernel(ids_ref, t1_ref, b1_ref, w2_ref, b2_ref, o_ref):
    tm, seq = ids_ref.shape            # batch tile, sequence length (static)
    vocab, hidden = t1_ref.shape

    ids = ids_ref[...]                 # (tm, S) int32, this tile's rows only
    inv_seq = jnp.float32(1.0 / seq)

    # Synthetic base model fused with the first dense: vocab-chunked
    # one-hot-count matmul.  counts chunk (tm, VC) f32 stays in vregs across
    # the S compares; it is consumed immediately by an accumulating dot.
    acc = jnp.zeros((tm, hidden), jnp.float32)
    for c in range(vocab // VC):                              # static unroll
        vid = lax.broadcasted_iota(jnp.int32, (1, VC), 1) + c * VC   # (1, VC)
        counts = jnp.zeros((tm, VC), jnp.float32)
        for s in range(seq):                                  # static unroll
            counts = counts + (ids[:, s:s + 1] == vid).astype(jnp.float32)
        acc = acc + jnp.dot(counts.astype(jnp.bfloat16),      # counts <= S exact
                            t1_ref[c * VC:(c + 1) * VC, :],
                            preferred_element_type=jnp.float32)

    # relu(dropout(dense(x))), dropout p = 0.0
    h = jnp.maximum(acc * inv_seq + b1_ref[...], 0.0)

    # relu(out_proj(.)), lane-dense padded logits (cols 7..127 stay 0)
    y = jnp.dot(h.astype(jnp.bfloat16), w2_ref[...],
                preferred_element_type=jnp.float32)
    o_ref[...] = jnp.maximum(y + b2_ref[...], 0.0)            # (tm, 128)


def codet5_classification_forward(input_ids, params):
    """input_ids: (B, S) int32 -> logits (B, 7) f32, one fused Pallas call."""
    B, S = input_ids.shape
    vocab, hidden = params["t1"].shape

    TM = min(128, _round_up(B, 8))            # batch tile (sublane-friendly)
    B_pad = _round_up(B, TM)
    # keep >= 2 grid steps on moderate+ batches so v7x's 2 TCs both get work
    if B_pad // TM < 2 and B_pad >= 16:
        TM = _round_up(B_pad // 2, 8)
        B_pad = _round_up(B, TM)

    ids = input_ids
    if B_pad != B:
        ids = jnp.pad(input_ids, ((0, B_pad - B), (0, 0)))

    grid = (B_pad // TM,)
    out = pl.pallas_call(
        _fused_kernel,
        out_shape=jax.ShapeDtypeStruct((B_pad, OUT_PAD), jnp.float32),
        grid_spec=pltpu.PrefetchScalarGridSpec(
            num_scalar_prefetch=0,
            grid=grid,
            in_specs=[
                pl.BlockSpec((TM, S), lambda i: (i, 0)),            # ids, per-tile
                pl.BlockSpec((vocab, hidden), lambda i: (0, 0)),    # T1 = emb@W1 (bf16)
                pl.BlockSpec((1, hidden), lambda i: (0, 0)),        # b1 (f32)
                pl.BlockSpec((hidden, OUT_PAD), lambda i: (0, 0)),  # W2 padded (bf16)
                pl.BlockSpec((1, OUT_PAD), lambda i: (0, 0)),       # b2 padded (f32)
            ],
            out_specs=pl.BlockSpec((TM, OUT_PAD), lambda i: (i, 0)),
        ),
        compiler_params=pltpu.CompilerParams(
            dimension_semantics=("parallel",)),   # shards batch tiles on v7x's 2 TCs
        # NOTE: with the real ~32k CodeT5 vocab, add pipeline_mode=pl.Buffered(1)
        # on the resident weight specs and set vmem_limit_bytes explicitly.
    )(ids, params["t1"], params["b1"], params["w2"], params["b2"])
    return out[:B, :NUM_CLASSES]


# ---------------------------------------------------------------------------
# Deterministic parameter init (mimics nn.Linear uniform(-1/sqrt(fan_in), .)).
# Weights pre-transposed as (in, out).  T1 = emb_table @ W1 folded offline
# (built in f32, stored bf16).  W2/b2 zero-padded to 128 lanes.
# ---------------------------------------------------------------------------
def init_params(key, vocab_size=VOCAB):
    k_emb, k_w1, k_b1, k_w2, k_b2 = jax.random.split(key, 5)
    bound = 1.0 / jnp.sqrt(jnp.float32(HIDDEN))
    emb = jax.random.normal(k_emb, (vocab_size, HIDDEN), jnp.float32) * 0.02
    w1 = jax.random.uniform(k_w1, (HIDDEN, HIDDEN), jnp.float32, -bound, bound)
    b1 = jax.random.uniform(k_b1, (1, HIDDEN), jnp.float32, -bound, bound)
    w2 = jax.random.uniform(k_w2, (HIDDEN, NUM_CLASSES), jnp.float32, -bound, bound)
    b2 = jax.random.uniform(k_b2, (1, NUM_CLASSES), jnp.float32, -bound, bound)
    t1 = jnp.dot(emb, w1, preferred_element_type=jnp.float32).astype(jnp.bfloat16)
    return {
        # kernel operands
        "t1": t1,
        "b1": b1,
        "w2": jnp.pad(w2, ((0, 0), (0, OUT_PAD - NUM_CLASSES))).astype(jnp.bfloat16),
        "b2": jnp.pad(b2, ((0, 0), (0, OUT_PAD - NUM_CLASSES))),
        # unfused originals, only used by the pure-JAX reference
        "emb_table": emb.astype(jnp.bfloat16),
        "w1": w1.astype(jnp.bfloat16),
    }


# ---------------------------------------------------------------------------
# Pure-JAX reference (unfused: explicit gather + mean-pool, then dense / relu /
# out_proj / relu; bf16 operands with f32 accumulation).
# ---------------------------------------------------------------------------
def reference_forward(input_ids, params):
    tab = params["emb_table"].astype(jnp.float32)
    emb = jnp.take(tab, input_ids, axis=0).mean(axis=1)          # (B, 256) f32
    h = jnp.dot(emb.astype(jnp.bfloat16), params["w1"],
                preferred_element_type=jnp.float32) + params["b1"]
    h = jnp.maximum(h, 0.0)
    y = jnp.dot(h.astype(jnp.bfloat16), params["w2"],
                preferred_element_type=jnp.float32) + params["b2"]
    y = jnp.maximum(y, 0.0)
    return y[:, :NUM_CLASSES]


if __name__ == "__main__":
    key = jax.random.PRNGKey(0)
    params = init_params(key)

    B, S = 8, 16
    input_ids = jax.random.randint(jax.random.PRNGKey(1), (B, S), 0, VOCAB,
                                   dtype=jnp.int32)

    fwd = jax.jit(codet5_classification_forward)
    out = jax.block_until_ready(fwd(input_ids, params))

    ref = reference_forward(input_ids, params)
    assert out.shape == (B, NUM_CLASSES)
    assert jnp.allclose(out, ref, atol=5e-3, rtol=5e-2), \
        float(jnp.max(jnp.abs(out - ref)))

    print("KERNEL_OK")
</pallas_src>

<mosaic_0001>
module attributes {stable_mosaic.version = 11 : i64} {
  func.func @_fused_kernel(%arg0: i32, %arg1: memref<8x16xi32, #tpu.memory_space<vmem>>, %arg2: memref<1024x256xbf16, #tpu.memory_space<vmem>>, %arg3: memref<1x256xf32, #tpu.memory_space<vmem>>, %arg4: memref<256x128xbf16, #tpu.memory_space<vmem>>, %arg5: memref<1x128xf32, #tpu.memory_space<vmem>>, %arg6: memref<8x128xf32, #tpu.memory_space<vmem>>) attributes {dimension_semantics = [#tpu.dimension_semantics<parallel>], iteration_bounds = array<i64: 1>, scalar_prefetch = 0 : i64, scratch_operands = 0 : i64, tpu.core_type = #tpu.core_type<tc>, window_params = [{transform_indices = @transform_0, window_bounds = array<i64: 8, 16>}, {pipeline_mode = #tpu.pipeline_mode<synchronous>, transform_indices = @transform_1, window_bounds = array<i64: 1024, 256>}, {pipeline_mode = #tpu.pipeline_mode<synchronous>, transform_indices = @transform_2, window_bounds = array<i64: 1, 256>}, {pipeline_mode = #tpu.pipeline_mode<synchronous>, transform_indices = @transform_3, window_bounds = array<i64: 256, 128>}, {pipeline_mode = #tpu.pipeline_mode<synchronous>, transform_indices = @transform_4, window_bounds = array<i64: 1, 128>}, {transform_indices = @transform_5, window_bounds = array<i64: 8, 128>}]} {
    %c0 = arith.constant 0 : index
    %c0_0 = arith.constant 0 : index
    %0 = vector.load %arg1[%c0, %c0_0] : memref<8x16xi32, #tpu.memory_space<vmem>>, vector<8x16xi32>
    %cst = arith.constant 0.000000e+00 : f32
    %1 = vector.broadcast %cst : f32 to vector<8x256xf32>
    %2 = tpu.iota {dimensions = array<i32: 1>} : vector<1x128xi32>
    %c0_i32 = arith.constant 0 : i32
    %3 = vector.broadcast %c0_i32 : i32 to vector<1x128xi32>
    %4 = arith.addi %2, %3 : vector<1x128xi32>
    %cst_1 = arith.constant 0.000000e+00 : f32
    %5 = vector.broadcast %cst_1 : f32 to vector<8x128xf32>
    %6 = vector.extract_strided_slice %0 {offsets = [0, 0], sizes = [8, 1], strides = [1, 1]} : vector<8x16xi32> to vector<8x1xi32>
    %7 = vector.broadcast %6 : vector<8x1xi32> to vector<8x128xi32>
    %8 = vector.broadcast %4 : vector<1x128xi32> to vector<8x128xi32>
    %9 = arith.cmpi eq, %7, %8 : vector<8x128xi32>
    %10 = arith.extui %9 : vector<8x128xi1> to vector<8x128xi32>
    %11 = arith.sitofp %10 : vector<8x128xi32> to vector<8x128xf32>
    %12 = arith.addf %5, %11 : vector<8x128xf32>
    %13 = vector.extract_strided_slice %0 {offsets = [0, 1], sizes = [8, 1], strides = [1, 1]} : vector<8x16xi32> to vector<8x1xi32>
    %14 = vector.broadcast %13 : vector<8x1xi32> to vector<8x128xi32>
    %15 = vector.broadcast %4 : vector<1x128xi32> to vector<8x128xi32>
    %16 = arith.cmpi eq, %14, %15 : vector<8x128xi32>
    %17 = arith.extui %16 : vector<8x128xi1> to vector<8x128xi32>
    %18 = arith.sitofp %17 : vector<8x128xi32> to vector<8x128xf32>
    %19 = arith.addf %12, %18 : vector<8x128xf32>
    %20 = vector.extract_strided_slice %0 {offsets = [0, 2], sizes = [8, 1], strides = [1, 1]} : vector<8x16xi32> to vector<8x1xi32>
    %21 = vector.broadcast %20 : vector<8x1xi32> to vector<8x128xi32>
    %22 = vector.broadcast %4 : vector<1x128xi32> to vector<8x128xi32>
    %23 = arith.cmpi eq, %21, %22 : vector<8x128xi32>
    %24 = arith.extui %23 : vector<8x128xi1> to vector<8x128xi32>
    %25 = arith.sitofp %24 : vector<8x128xi32> to vector<8x128xf32>
    %26 = arith.addf %19, %25 : vector<8x128xf32>
    %27 = vector.extract_strided_slice %0 {offsets = [0, 3], sizes = [8, 1], strides = [1, 1]} : vector<8x16xi32> to vector<8x1xi32>
    %28 = vector.broadcast %27 : vector<8x1xi32> to vector<8x128xi32>
    %29 = vector.broadcast %4 : vector<1x128xi32> to vector<8x128xi32>
    %30 = arith.cmpi eq, %28, %29 : vector<8x128xi32>
    %31 = arith.extui %30 : vector<8x128xi1> to vector<8x128xi32>
    %32 = arith.sitofp %31 : vector<8x128xi32> to vector<8x128xf32>
    %33 = arith.addf %26, %32 : vector<8x128xf32>
    %34 = vector.extract_strided_slice %0 {offsets = [0, 4], sizes = [8, 1], strides = [1, 1]} : vector<8x16xi32> to vector<8x1xi32>
    %35 = vector.broadcast %34 : vector<8x1xi32> to vector<8x128xi32>
    %36 = vector.broadcast %4 : vector<1x128xi32> to vector<8x128xi32>
    %37 = arith.cmpi eq, %35, %36 : vector<8x128xi32>
    %38 = arith.extui %37 : vector<8x128xi1> to vector<8x128xi32>
    %39 = arith.sitofp %38 : vector<8x128xi32> to vector<8x128xf32>
    %40 = arith.addf %33, %39 : vector<8x128xf32>
    %41 = vector.extract_strided_slice %0 {offsets = [0, 5], sizes = [8, 1], strides = [1, 1]} : vector<8x16xi32> to vector<8x1xi32>
    %42 = vector.broadcast %41 : vector<8x1xi32> to vector<8x128xi32>
    %43 = vector.broadcast %4 : vector<1x128xi32> to vector<8x128xi32>
    %44 = arith.cmpi eq, %42, %43 : vector<8x128xi32>
    %45 = arith.extui %44 : vector<8x128xi1> to vector<8x128xi32>
    %46 = arith.sitofp %45 : vector<8x128xi32> to vector<8x128xf32>
    %47 = arith.addf %40, %46 : vector<8x128xf32>
    %48 = vector.extract_strided_slice %0 {offsets = [0, 6], sizes = [8, 1], strides = [1, 1]} : vector<8x16xi32> to vector<8x1xi32>
    %49 = vector.broadcast %48 : vector<8x1xi32> to vector<8x128xi32>
    %50 = vector.broadcast %4 : vector<1x128xi32> to vector<8x128xi32>
    %51 = arith.cmpi eq, %49, %50 : vector<8x128xi32>
    %52 = arith.extui %51 : vector<8x128xi1> to vector<8x128xi32>
    %53 = arith.sitofp %52 : vector<8x128xi32> to vector<8x128xf32>
    %54 = arith.addf %47, %53 : vector<8x128xf32>
    %55 = vector.extract_strided_slice %0 {offsets = [0, 7], sizes = [8, 1], strides = [1, 1]} : vector<8x16xi32> to vector<8x1xi32>
    %56 = vector.broadcast %55 : vector<8x1xi32> to vector<8x128xi32>
    %57 = vector.broadcast %4 : vector<1x128xi32> to vector<8x128xi32>
    %58 = arith.cmpi eq, %56, %57 : vector<8x128xi32>
    %59 = arith.extui %58 : vector<8x128xi1> to vector<8x128xi32>
    %60 = arith.sitofp %59 : vector<8x128xi32> to vector<8x128xf32>
    %61 = arith.addf %54, %60 : vector<8x128xf32>
    %62 = vector.extract_strided_slice %0 {offsets = [0, 8], sizes = [8, 1], strides = [1, 1]} : vector<8x16xi32> to vector<8x1xi32>
    %63 = vector.broadcast %62 : vector<8x1xi32> to vector<8x128xi32>
    %64 = vector.broadcast %4 : vector<1x128xi32> to vector<8x128xi32>
    %65 = arith.cmpi eq, %63, %64 : vector<8x128xi32>
    %66 = arith.extui %65 : vector<8x128xi1> to vector<8x128xi32>
    %67 = arith.sitofp %66 : vector<8x128xi32> to vector<8x128xf32>
    %68 = arith.addf %61, %67 : vector<8x128xf32>
    %69 = vector.extract_strided_slice %0 {offsets = [0, 9], sizes = [8, 1], strides = [1, 1]} : vector<8x16xi32> to vector<8x1xi32>
    %70 = vector.broadcast %69 : vector<8x1xi32> to vector<8x128xi32>
    %71 = vector.broadcast %4 : vector<1x128xi32> to vector<8x128xi32>
    %72 = arith.cmpi eq, %70, %71 : vector<8x128xi32>
    %73 = arith.extui %72 : vector<8x128xi1> to vector<8x128xi32>
    %74 = arith.sitofp %73 : vector<8x128xi32> to vector<8x128xf32>
    %75 = arith.addf %68, %74 : vector<8x128xf32>
    %76 = vector.extract_strided_slice %0 {offsets = [0, 10], sizes = [8, 1], strides = [1, 1]} : vector<8x16xi32> to vector<8x1xi32>
    %77 = vector.broadcast %76 : vector<8x1xi32> to vector<8x128xi32>
    %78 = vector.broadcast %4 : vector<1x128xi32> to vector<8x128xi32>
    %79 = arith.cmpi eq, %77, %78 : vector<8x128xi32>
    %80 = arith.extui %79 : vector<8x128xi1> to vector<8x128xi32>
    %81 = arith.sitofp %80 : vector<8x128xi32> to vector<8x128xf32>
    %82 = arith.addf %75, %81 : vector<8x128xf32>
    %83 = vector.extract_strided_slice %0 {offsets = [0, 11], sizes = [8, 1], strides = [1, 1]} : vector<8x16xi32> to vector<8x1xi32>
    %84 = vector.broadcast %83 : vector<8x1xi32> to vector<8x128xi32>
    %85 = vector.broadcast %4 : vector<1x128xi32> to vector<8x128xi32>
    %86 = arith.cmpi eq, %84, %85 : vector<8x128xi32>
    %87 = arith.extui %86 : vector<8x128xi1> to vector<8x128xi32>
    %88 = arith.sitofp %87 : vector<8x128xi32> to vector<8x128xf32>
    %89 = arith.addf %82, %88 : vector<8x128xf32>
    %90 = vector.extract_strided_slice %0 {offsets = [0, 12], sizes = [8, 1], strides = [1, 1]} : vector<8x16xi32> to vector<8x1xi32>
    %91 = vector.broadcast %90 : vector<8x1xi32> to vector<8x128xi32>
    %92 = vector.broadcast %4 : vector<1x128xi32> to vector<8x128xi32>
    %93 = arith.cmpi eq, %91, %92 : vector<8x128xi32>
    %94 = arith.extui %93 : vector<8x128xi1> to vector<8x128xi32>
    %95 = arith.sitofp %94 : vector<8x128xi32> to vector<8x128xf32>
    %96 = arith.addf %89, %95 : vector<8x128xf32>
    %97 = vector.extract_strided_slice %0 {offsets = [0, 13], sizes = [8, 1], strides = [1, 1]} : vector<8x16xi32> to vector<8x1xi32>
    %98 = vector.broadcast %97 : vector<8x1xi32> to vector<8x128xi32>
    %99 = vector.broadcast %4 : vector<1x128xi32> to vector<8x128xi32>
    %100 = arith.cmpi eq, %98, %99 : vector<8x128xi32>
    %101 = arith.extui %100 : vector<8x128xi1> to vector<8x128xi32>
    %102 = arith.sitofp %101 : vector<8x128xi32> to vector<8x128xf32>
    %103 = arith.addf %96, %102 : vector<8x128xf32>
    %104 = vector.extract_strided_slice %0 {offsets = [0, 14], sizes = [8, 1], strides = [1, 1]} : vector<8x16xi32> to vector<8x1xi32>
    %105 = vector.broadcast %104 : vector<8x1xi32> to vector<8x128xi32>
    %106 = vector.broadcast %4 : vector<1x128xi32> to vector<8x128xi32>
    %107 = arith.cmpi eq, %105, %106 : vector<8x128xi32>
    %108 = arith.extui %107 : vector<8x128xi1> to vector<8x128xi32>
    %109 = arith.sitofp %108 : vector<8x128xi32> to vector<8x128xf32>
    %110 = arith.addf %103, %109 : vector<8x128xf32>
    %111 = vector.extract_strided_slice %0 {offsets = [0, 15], sizes = [8, 1], strides = [1, 1]} : vector<8x16xi32> to vector<8x1xi32>
    %112 = vector.broadcast %111 : vector<8x1xi32> to vector<8x128xi32>
    %113 = vector.broadcast %4 : vector<1x128xi32> to vector<8x128xi32>
    %114 = arith.cmpi eq, %112, %113 : vector<8x128xi32>
    %115 = arith.extui %114 : vector<8x128xi1> to vector<8x128xi32>
    %116 = arith.sitofp %115 : vector<8x128xi32> to vector<8x128xf32>
    %117 = arith.addf %110, %116 : vector<8x128xf32>
    %118 = arith.truncf %117 : vector<8x128xf32> to vector<8x128xbf16>
    %c0_2 = arith.constant 0 : index
    %c0_3 = arith.constant 0 : index
    %119 = vector.load %arg2[%c0_2, %c0_3] : memref<1024x256xbf16, #tpu.memory_space<vmem>>, vector<128x256xbf16>
    %cst_4 = arith.constant dense<0.000000e+00> : vector<8x256xf32>
    %120 = tpu.matmul %118, %119, %cst_4 {dimension_numbers = #tpu.dot_dimension_numbers<[1], [0], [0], [1], [0, 0, 1, 1], [], []>} : vector<8x128xbf16>, vector<128x256xbf16>, vector<8x256xf32> -> vector<8x256xf32>
    %121 = arith.addf %1, %120 : vector<8x256xf32>
    %122 = tpu.iota {dimensions = array<i32: 1>} : vector<1x128xi32>
    %c128_i32 = arith.constant 128 : i32
    %123 = vector.broadcast %c128_i32 : i32 to vector<1x128xi32>
    %124 = arith.addi %122, %123 : vector<1x128xi32>
    %cst_5 = arith.constant 0.000000e+00 : f32
    %125 = vector.broadcast %cst_5 : f32 to vector<8x128xf32>
    %126 = vector.extract_strided_slice %0 {offsets = [0, 0], sizes = [8, 1], strides = [1, 1]} : vector<8x16xi32> to vector<8x1xi32>
    %127 = vector.broadcast %126 : vector<8x1xi32> to vector<8x128xi32>
    %128 = vector.broadcast %124 : vector<1x128xi32> to vector<8x128xi32>
    %129 = arith.cmpi eq, %127, %128 : vector<8x128xi32>
    %130 = arith.extui %129 : vector<8x128xi1> to vector<8x128xi32>
    %131 = arith.sitofp %130 : vector<8x128xi32> to vector<8x128xf32>
    %132 = arith.addf %125, %131 : vector<8x128xf32>
    %133 = vector.extract_strided_slice %0 {offsets = [0, 1], sizes = [8, 1], strides = [1, 1]} : vector<8x16xi32> to vector<8x1xi32>
    %134 = vector.broadcast %133 : vector<8x1xi32> to vector<8x128xi32>
    %135 = vector.broadcast %124 : vector<1x128xi32> to vector<8x128xi32>
    %136 = arith.cmpi eq, %134, %135 : vector<8x128xi32>
    %137 = arith.extui %136 : vector<8x128xi1> to vector<8x128xi32>
    %138 = arith.sitofp %137 : vector<8x128xi32> to vector<8x128xf32>
    %139 = arith.addf %132, %138 : vector<8x128xf32>
    %140 = vector.extract_strided_slice %0 {offsets = [0, 2], sizes = [8, 1], strides = [1, 1]} : vector<8x16xi32> to vector<8x1xi32>
    %141 = vector.broadcast %140 : vector<8x1xi32> to vector<8x128xi32>
    %142 = vector.broadcast %124 : vector<1x128xi32> to vector<8x128xi32>
    %143 = arith.cmpi eq, %141, %142 : vector<8x128xi32>
    %144 = arith.extui %143 : vector<8x128xi1> to vector<8x128xi32>
    %145 = arith.sitofp %144 : vector<8x128xi32> to vector<8x128xf32>
    %146 = arith.addf %139, %145 : vector<8x128xf32>
    %147 = vector.extract_strided_slice %0 {offsets = [0, 3], sizes = [8, 1], strides = [1, 1]} : vector<8x16xi32> to vector<8x1xi32>
    %148 = vector.broadcast %147 : vector<8x1xi32> to vector<8x128xi32>
    %149 = vector.broadcast %124 : vector<1x128xi32> to vector<8x128xi32>
    %150 = arith.cmpi eq, %148, %149 : vector<8x128xi32>
    %151 = arith.extui %150 : vector<8x128xi1> to vector<8x128xi32>
    %152 = arith.sitofp %151 : vector<8x128xi32> to vector<8x128xf32>
    %153 = arith.addf %146, %152 : vector<8x128xf32>
    %154 = vector.extract_strided_slice %0 {offsets = [0, 4], sizes = [8, 1], strides = [1, 1]} : vector<8x16xi32> to vector<8x1xi32>
    %155 = vector.broadcast %154 : vector<8x1xi32> to vector<8x128xi32>
    %156 = vector.broadcast %124 : vector<1x128xi32> to vector<8x128xi32>
    %157 = arith.cmpi eq, %155, %156 : vector<8x128xi32>
    %158 = arith.extui %157 : vector<8x128xi1> to vector<8x128xi32>
    %159 = arith.sitofp %158 : vector<8x128xi32> to vector<8x128xf32>
    %160 = arith.addf %153, %159 : vector<8x128xf32>
    %161 = vector.extract_strided_slice %0 {offsets = [0, 5], sizes = [8, 1], strides = [1, 1]} : vector<8x16xi32> to vector<8x1xi32>
    %162 = vector.broadcast %161 : vector<8x1xi32> to vector<8x128xi32>
    %163 = vector.broadcast %124 : vector<1x128xi32> to vector<8x128xi32>
    %164 = arith.cmpi eq, %162, %163 : vector<8x128xi32>
    %165 = arith.extui %164 : vector<8x128xi1> to vector<8x128xi32>
    %166 = arith.sitofp %165 : vector<8x128xi32> to vector<8x128xf32>
    %167 = arith.addf %160, %166 : vector<8x128xf32>
    %168 = vector.extract_strided_slice %0 {offsets = [0, 6], sizes = [8, 1], strides = [1, 1]} : vector<8x16xi32> to vector<8x1xi32>
    %169 = vector.broadcast %168 : vector<8x1xi32> to vector<8x128xi32>
    %170 = vector.broadcast %124 : vector<1x128xi32> to vector<8x128xi32>
    %171 = arith.cmpi eq, %169, %170 : vector<8x128xi32>
    %172 = arith.extui %171 : vector<8x128xi1> to vector<8x128xi32>
    %173 = arith.sitofp %172 : vector<8x128xi32> to vector<8x128xf32>
    %174 = arith.addf %167, %173 : vector<8x128xf32>
    %175 = vector.extract_strided_slice %0 {offsets = [0, 7], sizes = [8, 1], strides = [1, 1]} : vector<8x16xi32> to vector<8x1xi32>
    %176 = vector.broadcast %175 : vector<8x1xi32> to vector<8x128xi32>
    %177 = vector.broadcast %124 : vector<1x128xi32> to vector<8x128xi32>
    %178 = arith.cmpi eq, %176, %177 : vector<8x128xi32>
    %179 = arith.extui %178 : vector<8x128xi1> to vector<8x128xi32>
    %180 = arith.sitofp %179 : vector<8x128xi32> to vector<8x128xf32>
    %181 = arith.addf %174, %180 : vector<8x128xf32>
    %182 = vector.extract_strided_slice %0 {offsets = [0, 8], sizes = [8, 1], strides = [1, 1]} : vector<8x16xi32> to vector<8x1xi32>
    %183 = vector.broadcast %182 : vector<8x1xi32> to vector<8x128xi32>
    %184 = vector.broadcast %124 : vector<1x128xi32> to vector<8x128xi32>
    %185 = arith.cmpi eq, %183, %184 : vector<8x128xi32>
    %186 = arith.extui %185 : vector<8x128xi1> to vector<8x128xi32>
    %187 = arith.sitofp %186 : vector<8x128xi32> to vector<8x128xf32>
    %188 = arith.addf %181, %187 : vector<8x128xf32>
    %189 = vector.extract_strided_slice %0 {offsets = [0, 9], sizes = [8, 1], strides = [1, 1]} : vector<8x16xi32> to vector<8x1xi32>
    %190 = vector.broadcast %189 : vector<8x1xi32> to vector<8x128xi32>
    %191 = vector.broadcast %124 : vector<1x128xi32> to vector<8x128xi32>
    %192 = arith.cmpi eq, %190, %191 : vector<8x128xi32>
    %193 = arith.extui %192 : vector<8x128xi1> to vector<8x128xi32>
    %194 = arith.sitofp %193 : vector<8x128xi32> to vector<8x128xf32>
    %195 = arith.addf %188, %194 : vector<8x128xf32>
    %196 = vector.extract_strided_slice %0 {offsets = [0, 10], sizes = [8, 1], strides = [1, 1]} : vector<8x16xi32> to vector<8x1xi32>
    %197 = vector.broadcast %196 : vector<8x1xi32> to vector<8x128xi32>
    %198 = vector.broadcast %124 : vector<1x128xi32> to vector<8x128xi32>
    %199 = arith.cmpi eq, %197, %198 : vector<8x128xi32>
    %200 = arith.extui %199 : vector<8x128xi1> to vector<8x128xi32>
    %201 = arith.sitofp %200 : vector<8x128xi32> to vector<8x128xf32>
    %202 = arith.addf %195, %201 : vector<8x128xf32>
    %203 = vector.extract_strided_slice %0 {offsets = [0, 11], sizes = [8, 1], strides = [1, 1]} : vector<8x16xi32> to vector<8x1xi32>
    %204 = vector.broadcast %203 : vector<8x1xi32> to vector<8x128xi32>
    %205 = vector.broadcast %124 : vector<1x128xi32> to vector<8x128xi32>
    %206 = arith.cmpi eq, %204, %205 : vector<8x128xi32>
    %207 = arith.extui %206 : vector<8x128xi1> to vector<8x128xi32>
    %208 = arith.sitofp %207 : vector<8x128xi32> to vector<8x128xf32>
    %209 = arith.addf %202, %208 : vector<8x128xf32>
    %210 = vector.extract_strided_slice %0 {offsets = [0, 12], sizes = [8, 1], strides = [1, 1]} : vector<8x16xi32> to vector<8x1xi32>
    %211 = vector.broadcast %210 : vector<8x1xi32> to vector<8x128xi32>
    %212 = vector.broadcast %124 : vector<1x128xi32> to vector<8x128xi32>
    %213 = arith.cmpi eq, %211, %212 : vector<8x128xi32>
    %214 = arith.extui %213 : vector<8x128xi1> to vector<8x128xi32>
    %215 = arith.sitofp %214 : vector<8x128xi32> to vector<8x128xf32>
    %216 = arith.addf %209, %215 : vector<8x128xf32>
    %217 = vector.extract_strided_slice %0 {offsets = [0, 13], sizes = [8, 1], strides = [1, 1]} : vector<8x16xi32> to vector<8x1xi32>
    %218 = vector.broadcast %217 : vector<8x1xi32> to vector<8x128xi32>
    %219 = vector.broadcast %124 : vector<1x128xi32> to vector<8x128xi32>
    %220 = arith.cmpi eq, %218, %219 : vector<8x128xi32>
    %221 = arith.extui %220 : vector<8x128xi1> to vector<8x128xi32>
    %222 = arith.sitofp %221 : vector<8x128xi32> to vector<8x128xf32>
    %223 = arith.addf %216, %222 : vector<8x128xf32>
    %224 = vector.extract_strided_slice %0 {offsets = [0, 14], sizes = [8, 1], strides = [1, 1]} : vector<8x16xi32> to vector<8x1xi32>
    %225 = vector.broadcast %224 : vector<8x1xi32> to vector<8x128xi32>
    %226 = vector.broadcast %124 : vector<1x128xi32> to vector<8x128xi32>
    %227 = arith.cmpi eq, %225, %226 : vector<8x128xi32>
    %228 = arith.extui %227 : vector<8x128xi1> to vector<8x128xi32>
    %229 = arith.sitofp %228 : vector<8x128xi32> to vector<8x128xf32>
    %230 = arith.addf %223, %229 : vector<8x128xf32>
    %231 = vector.extract_strided_slice %0 {offsets = [0, 15], sizes = [8, 1], strides = [1, 1]} : vector<8x16xi32> to vector<8x1xi32>
    %232 = vector.broadcast %231 : vector<8x1xi32> to vector<8x128xi32>
    %233 = vector.broadcast %124 : vector<1x128xi32> to vector<8x128xi32>
    %234 = arith.cmpi eq, %232, %233 : vector<8x128xi32>
    %235 = arith.extui %234 : vector<8x128xi1> to vector<8x128xi32>
    %236 = arith.sitofp %235 : vector<8x128xi32> to vector<8x128xf32>
    %237 = arith.addf %230, %236 : vector<8x128xf32>
    %238 = arith.truncf %237 : vector<8x128xf32> to vector<8x128xbf16>
    %c128 = arith.constant 128 : index
    %c0_6 = arith.constant 0 : index
    %239 = vector.load %arg2[%c128, %c0_6] : memref<1024x256xbf16, #tpu.memory_space<vmem>>, vector<128x256xbf16>
    %cst_7 = arith.constant dense<0.000000e+00> : vector<8x256xf32>
    %240 = tpu.matmul %238, %239, %cst_7 {dimension_numbers = #tpu.dot_dimension_numbers<[1], [0], [0], [1], [0, 0, 1, 1], [], []>} : vector<8x128xbf16>, vector<128x256xbf16>, vector<8x256xf32> -> vector<8x256xf32>
    %241 = arith.addf %121, %240 : vector<8x256xf32>
    %242 = tpu.iota {dimensions = array<i32: 1>} : vector<1x128xi32>
    %c256_i32 = arith.constant 256 : i32
    %243 = vector.broadcast %c256_i32 : i32 to vector<1x128xi32>
    %244 = arith.addi %242, %243 : vector<1x128xi32>
    %cst_8 = arith.constant 0.000000e+00 : f32
    %245 = vector.broadcast %cst_8 : f32 to vector<8x128xf32>
    %246 = vector.extract_strided_slice %0 {offsets = [0, 0], sizes = [8, 1], strides = [1, 1]} : vector<8x16xi32> to vector<8x1xi32>
    %247 = vector.broadcast %246 : vector<8x1xi32> to vector<8x128xi32>
    %248 = vector.broadcast %244 : vector<1x128xi32> to vector<8x128xi32>
    %249 = arith.cmpi eq, %247, %248 : vector<8x128xi32>
    %250 = arith.extui %249 : vector<8x128xi1> to vector<8x128xi32>
    %251 = arith.sitofp %250 : vector<8x128xi32> to vector<8x128xf32>
    %252 = arith.addf %245, %251 : vector<8x128xf32>
    %253 = vector.extract_strided_slice %0 {offsets = [0, 1], sizes = [8, 1], strides = [1, 1]} : vector<8x16xi32> to vector<8x1xi32>
    %254 = vector.broadcast %253 : vector<8x1xi32> to vector<8x128xi32>
    %255 = vector.broadcast %244 : vector<1x128xi32> to vector<8x128xi32>
    %256 = arith.cmpi eq, %254, %255 : vector<8x128xi32>
    %257 = arith.extui %256 : vector<8x128xi1> to vector<8x128xi32>
    %258 = arith.sitofp %257 : vector<8x128xi32> to vector<8x128xf32>
    %259 = arith.addf %252, %258 : vector<8x128xf32>
    %260 = vector.extract_strided_slice %0 {offsets = [0, 2], sizes = [8, 1], strides = [1, 1]} : vector<8x16xi32> to vector<8x1xi32>
    %261 = vector.broadcast %260 : vector<8x1xi32> to vector<8x128xi32>
    %262 = vector.broadcast %244 : vector<1x128xi32> to vector<8x128xi32>
    %263 = arith.cmpi eq, %261, %262 : vector<8x128xi32>
    %264 = arith.extui %263 : vector<8x128xi1> to vector<8x128xi32>
    %265 = arith.sitofp %264 : vector<8x128xi32> to vector<8x128xf32>
    %266 = arith.addf %259, %265 : vector<8x128xf32>
    %267 = vector.extract_strided_slice %0 {offsets = [0, 3], sizes = [8, 1], strides = [1, 1]} : vector<8x16xi32> to vector<8x1xi32>
    %268 = vector.broadcast %267 : vector<8x1xi32> to vector<8x128xi32>
    %269 = vector.broadcast %244 : vector<1x128xi32> to vector<8x128xi32>
    %270 = arith.cmpi eq, %268, %269 : vector<8x128xi32>
    %271 = arith.extui %270 : vector<8x128xi1> to vector<8x128xi32>
    %272 = arith.sitofp %271 : vector<8x128xi32> to vector<8x128xf32>
    %273 = arith.addf %266, %272 : vector<8x128xf32>
    %274 = vector.extract_strided_slice %0 {offsets = [0, 4], sizes = [8, 1], strides = [1, 1]} : vector<8x16xi32> to vector<8x1xi32>
    %275 = vector.broadcast %274 : vector<8x1xi32> to vector<8x128xi32>
    %276 = vector.broadcast %244 : vector<1x128xi32> to vector<8x128xi32>
    %277 = arith.cmpi eq, %275, %276 : vector<8x128xi32>
    %278 = arith.extui %277 : vector<8x128xi1> to vector<8x128xi32>
    %279 = arith.sitofp %278 : vector<8x128xi32> to vector<8x128xf32>
    %280 = arith.addf %273, %279 : vector<8x128xf32>
    %281 = vector.extract_strided_slice %0 {offsets = [0, 5], sizes = [8, 1], strides = [1, 1]} : vector<8x16xi32> to vector<8x1xi32>
    %282 = vector.broadcast %281 : vector<8x1xi32> to vector<8x128xi32>
    %283 = vector.broadcast %244 : vector<1x128xi32> to vector<8x128xi32>
    %284 = arith.cmpi eq, %282, %283 : vector<8x128xi32>
    %285 = arith.extui %284 : vector<8x128xi1> to vector<8x128xi32>
    %286 = arith.sitofp %285 : vector<8x128xi32> to vector<8x128xf32>
    %287 = arith.addf %280, %286 : vector<8x128xf32>
    %288 = vector.extract_strided_slice %0 {offsets = [0, 6], sizes = [8, 1], strides = [1, 1]} : vector<8x16xi32> to vector<8x1xi32>
    %289 = vector.broadcast %288 : vector<8x1xi32> to vector<8x128xi32>
    %290 = vector.broadcast %244 : vector<1x128xi32> to vector<8x128xi32>
    %291 = arith.cmpi eq, %289, %290 : vector<8x128xi32>
    %292 = arith.extui %291 : vector<8x128xi1> to vector<8x128xi32>
    %293 = arith.sitofp %292 : vector<8x128xi32> to vector<8x128xf32>
    %294 = arith.addf %287, %293 : vector<8x128xf32>
    %295 = vector.extract_strided_slice %0 {offsets = [0, 7], sizes = [8, 1], strides = [1, 1]} : vector<8x16xi32> to vector<8x1xi32>
    %296 = vector.broadcast %295 : vector<8x1xi32> to vector<8x128xi32>
    %297 = vector.broadcast %244 : vector<1x128xi32> to vector<8x128xi32>
    %298 = arith.cmpi eq, %296, %297 : vector<8x128xi32>
    %299 = arith.extui %298 : vector<8x128xi1> to vector<8x128xi32>
    %300 = arith.sitofp %299 : vector<8x128xi32> to vector<8x128xf32>
    %301 = arith.addf %294, %300 : vector<8x128xf32>
    %302 = vector.extract_strided_slice %0 {offsets = [0, 8], sizes = [8, 1], strides = [1, 1]} : vector<8x16xi32> to vector<8x1xi32>
    %303 = vector.broadcast %302 : vector<8x1xi32> to vector<8x128xi32>
    %304 = vector.broadcast %244 : vector<1x128xi32> to vector<8x128xi32>
    %305 = arith.cmpi eq, %303, %304 : vector<8x128xi32>
    %306 = arith.extui %305 : vector<8x128xi1> to vector<8x128xi32>
    %307 = arith.sitofp %306 : vector<8x128xi32> to vector<8x128xf32>
    %308 = arith.addf %301, %307 : vector<8x128xf32>
    %309 = vector.extract_strided_slice %0 {offsets = [0, 9], sizes = [8, 1], strides = [1, 1]} : vector<8x16xi32> to vector<8x1xi32>
    %310 = vector.broadcast %309 : vector<8x1xi32> to vector<8x128xi32>
    %311 = vector.broadcast %244 : vector<1x128xi32> to vector<8x128xi32>
    %312 = arith.cmpi eq, %310, %311 : vector<8x128xi32>
    %313 = arith.extui %312 : vector<8x128xi1> to vector<8x128xi32>
    %314 = arith.sitofp %313 : vector<8x128xi32> to vector<8x128xf32>
    %315 = arith.addf %308, %314 : vector<8x128xf32>
    %316 = vector.extract_strided_slice %0 {offsets = [0, 10], sizes = [8, 1], strides = [1, 1]} : vector<8x16xi32> to vector<8x1xi32>
    %317 = vector.broadcast %316 : vector<8x1xi32> to vector<8x128xi32>
    %318 = vector.broadcast %244 : vector<1x128xi32> to vector<8x128xi32>
    %319 = arith.cmpi eq, %317, %318 : vector<8x128xi32>
    %320 = arith.extui %319 : vector<8x128xi1> to vector<8x128xi32>
    %321 = arith.sitofp %320 : vector<8x128xi32> to vector<8x128xf32>
    %322 = arith.addf %315, %321 : vector<8x128xf32>
    %323 = vector.extract_strided_slice %0 {offsets = [0, 11], sizes = [8, 1], strides = [1, 1]} : vector<8x16xi32> to vector<8x1xi32>
    %324 = vector.broadcast %323 : vector<8x1xi32> to vector<8x128xi32>
    %325 = vector.broadcast %244 : vector<1x128xi32> to vector<8x128xi32>
    %326 = arith.cmpi eq, %324, %325 : vector<8x128xi32>
    %327 = arith.extui %326 : vector<8x128xi1> to vector<8x128xi32>
    %328 = arith.sitofp %327 : vector<8x128xi32> to vector<8x128xf32>
    %329 = arith.addf %322, %328 : vector<8x128xf32>
    %330 = vector.extract_strided_slice %0 {offsets = [0, 12], sizes = [8, 1], strides = [1, 1]} : vector<8x16xi32> to vector<8x1xi32>
    %331 = vector.broadcast %330 : vector<8x1xi32> to vector<8x128xi32>
    %332 = vector.broadcast %244 : vector<1x128xi32> to vector<8x128xi32>
    %333 = arith.cmpi eq, %331, %332 : vector<8x128xi32>
    %334 = arith.extui %333 : vector<8x128xi1> to vector<8x128xi32>
    %335 = arith.sitofp %334 : vector<8x128xi32> to vector<8x128xf32>
    %336 = arith.addf %329, %335 : vector<8x128xf32>
    %337 = vector.extract_strided_slice %0 {offsets = [0, 13], sizes = [8, 1], strides = [1, 1]} : vector<8x16xi32> to vector<8x1xi32>
    %338 = vector.broadcast %337 : vector<8x1xi32> to vector<8x128xi32>
    %339 = vector.broadcast %244 : vector<1x128xi32> to vector<8x128xi32>
    %340 = arith.cmpi eq, %338, %339 : vector<8x128xi32>
    %341 = arith.extui %340 : vector<8x128xi1> to vector<8x128xi32>
    %342 = arith.sitofp %341 : vector<8x128xi32> to vector<8x128xf32>
    %343 = arith.addf %336, %342 : vector<8x128xf32>
    %344 = vector.extract_strided_slice %0 {offsets = [0, 14], sizes = [8, 1], strides = [1, 1]} : vector<8x16xi32> to vector<8x1xi32>
    %345 = vector.broadcast %344 : vector<8x1xi32> to vector<8x128xi32>
    %346 = vector.broadcast %244 : vector<1x128xi32> to vector<8x128xi32>
    %347 = arith.cmpi eq, %345, %346 : vector<8x128xi32>
    %348 = arith.extui %347 : vector<8x128xi1> to vector<8x128xi32>
    %349 = arith.sitofp %348 : vector<8x128xi32> to vector<8x128xf32>
    %350 = arith.addf %343, %349 : vector<8x128xf32>
    %351 = vector.extract_strided_slice %0 {offsets = [0, 15], sizes = [8, 1], strides = [1, 1]} : vector<8x16xi32> to vector<8x1xi32>
    %352 = vector.broadcast %351 : vector<8x1xi32> to vector<8x128xi32>
    %353 = vector.broadcast %244 : vector<1x128xi32> to vector<8x128xi32>
    %354 = arith.cmpi eq, %352, %353 : vector<8x128xi32>
    %355 = arith.extui %354 : vector<8x128xi1> to vector<8x128xi32>
    %356 = arith.sitofp %355 : vector<8x128xi32> to vector<8x128xf32>
    %357 = arith.addf %350, %356 : vector<8x128xf32>
    %358 = arith.truncf %357 : vector<8x128xf32> to vector<8x128xbf16>
    %c256 = arith.constant 256 : index
    %c0_9 = arith.constant 0 : index
    %359 = vector.load %arg2[%c256, %c0_9] : memref<1024x256xbf16, #tpu.memory_space<vmem>>, vector<128x256xbf16>
    %cst_10 = arith.constant dense<0.000000e+00> : vector<8x256xf32>
    %360 = tpu.matmul %358, %359, %cst_10 {dimension_numbers = #tpu.dot_dimension_numbers<[1], [0], [0], [1], [0, 0, 1, 1], [], []>} : vector<8x128xbf16>, vector<128x256xbf16>, vector<8x256xf32> -> vector<8x256xf32>
    %361 = arith.addf %241, %360 : vector<8x256xf32>
    %362 = tpu.iota {dimensions = array<i32: 1>} : vector<1x128xi32>
    %c384_i32 = arith.constant 384 : i32
    %363 = vector.broadcast %c384_i32 : i32 to vector<1x128xi32>
    %364 = arith.addi %362, %363 : vector<1x128xi32>
    %cst_11 = arith.constant 0.000000e+00 : f32
    %365 = vector.broadcast %cst_11 : f32 to vector<8x128xf32>
    %366 = vector.extract_strided_slice %0 {offsets = [0, 0], sizes = [8, 1], strides = [1, 1]} : vector<8x16xi32> to vector<8x1xi32>
    %367 = vector.broadcast %366 : vector<8x1xi32> to vector<8x128xi32>
    %368 = vector.broadcast %364 : vector<1x128xi32> to vector<8x128xi32>
    %369 = arith.cmpi eq, %367, %368 : vector<8x128xi32>
    %370 = arith.extui %369 : vector<8x128xi1> to vector<8x128xi32>
    %371 = arith.sitofp %370 : vector<8x128xi32> to vector<8x128xf32>
    %372 = arith.addf %365, %371 : vector<8x128xf32>
    %373 = vector.extract_strided_slice %0 {offsets = [0, 1], sizes = [8, 1], strides = [1, 1]} : vector<8x16xi32> to vector<8x1xi32>
    %374 = vector.broadcast %373 : vector<8x1xi32> to vector<8x128xi32>
    %375 = vector.broadcast %364 : vector<1x128xi32> to vector<8x128xi32>
    %376 = arith.cmpi eq, %374, %375 : vector<8x128xi32>
    %377 = arith.extui %376 : vector<8x128xi1> to vector<8x128xi32>
    %378 = arith.sitofp %377 : vector<8x128xi32> to vector<8x128xf32>
    %379 = arith.addf %372, %378 : vector<8x128xf32>
    %380 = vector.extract_strided_slice %0 {offsets = [0, 2], sizes = [8, 1], strides = [1, 1]} : vector<8x16xi32> to vector<8x1xi32>
    %381 = vector.broadcast %380 : vector<8x1xi32> to vector<8x128xi32>
    %382 = vector.broadcast %364 : vector<1x128xi32> to vector<8x128xi32>
    %383 = arith.cmpi eq, %381, %382 : vector<8x128xi32>
    %384 = arith.extui %383 : vector<8x128xi1> to vector<8x128xi32>
    %385 = arith.sitofp %384 : vector<8x128xi32> to vector<8x128xf32>
    %386 = arith.addf %379, %385 : vector<8x128xf32>
    %387 = vector.extract_strided_slice %0 {offsets = [0, 3], sizes = [8, 1], strides = [1, 1]} : vector<8x16xi32> to vector<8x1xi32>
    %388 = vector.broadcast %387 : vector<8x1xi32> to vector<8x128xi32>
    %389 = vector.broadcast %364 : vector<1x128xi32> to vector<8x128xi32>
    %390 = arith.cmpi eq, %388, %389 : vector<8x128xi32>
    %391 = arith.extui %390 : vector<8x128xi1> to vector<8x128xi32>
    %392 = arith.sitofp %391 : vector<8x128xi32> to vector<8x128xf32>
    %393 = arith.addf %386, %392 : vector<8x128xf32>
    %394 = vector.extract_strided_slice %0 {offsets = [0, 4], sizes = [8, 1], strides = [1, 1]} : vector<8x16xi32> to vector<8x1xi32>
    %395 = vector.broadcast %394 : vector<8x1xi32> to vector<8x128xi32>
    %396 = vector.broadcast %364 : vector<1x128xi32> to vector<8x128xi32>
    %397 = arith.cmpi eq, %395, %396 : vector<8x128xi32>
    %398 = arith.extui %397 : vector<8x128xi1> to vector<8x128xi32>
    %399 = arith.sitofp %398 : vector<8x128xi32> to vector<8x128xf32>
    %400 = arith.addf %393, %399 : vector<8x128xf32>
    %401 = vector.extract_strided_slice %0 {offsets = [0, 5], sizes = [8, 1], strides = [1, 1]} : vector<8x16xi32> to vector<8x1xi32>
    %402 = vector.broadcast %401 : vector<8x1xi32> to vector<8x128xi32>
    %403 = vector.broadcast %364 : vector<1x128xi32> to vector<8x128xi32>
    %404 = arith.cmpi eq, %402, %403 : vector<8x128xi32>
    %405 = arith.extui %404 : vector<8x128xi1> to vector<8x128xi32>
    %406 = arith.sitofp %405 : vector<8x128xi32> to vector<8x128xf32>
    %407 = arith.addf %400, %406 : vector<8x128xf32>
    %408 = vector.extract_strided_slice %0 {offsets = [0, 6], sizes = [8, 1], strides = [1, 1]} : vector<8x16xi32> to vector<8x1xi32>
    %409 = vector.broadcast %408 : vector<8x1xi32> to vector<8x128xi32>
    %410 = vector.broadcast %364 : vector<1x128xi32> to vector<8x128xi32>
    %411 = arith.cmpi eq, %409, %410 : vector<8x128xi32>
    %412 = arith.extui %411 : vector<8x128xi1> to vector<8x128xi32>
    %413 = arith.sitofp %412 : vector<8x128xi32> to vector<8x128xf32>
    %414 = arith.addf %407, %413 : vector<8x128xf32>
    %415 = vector.extract_strided_slice %0 {offsets = [0, 7], sizes = [8, 1], strides = [1, 1]} : vector<8x16xi32> to vector<8x1xi32>
    %416 = vector.broadcast %415 : vector<8x1xi32> to vector<8x128xi32>
    %417 = vector.broadcast %364 : vector<1x128xi32> to vector<8x128xi32>
    %418 = arith.cmpi eq, %416, %417 : vector<8x128xi32>
    %419 = arith.extui %418 : vector<8x128xi1> to vector<8x128xi32>
    %420 = arith.sitofp %419 : vector<8x128xi32> to vector<8x128xf32>
    %421 = arith.addf %414, %420 : vector<8x128xf32>
    %422 = vector.extract_strided_slice %0 {offsets = [0, 8], sizes = [8, 1], strides = [1, 1]} : vector<8x16xi32> to vector<8x1xi32>
    %423 = vector.broadcast %422 : vector<8x1xi32> to vector<8x128xi32>
    %424 = vector.broadcast %364 : vector<1x128xi32> to vector<8x128xi32>
    %425 = arith.cmpi eq, %423, %424 : vector<8x128xi32>
    %426 = arith.extui %425 : vector<8x128xi1> to vector<8x128xi32>
    %427 = arith.sitofp %426 : vector<8x128xi32> to vector<8x128xf32>
    %428 = arith.addf %421, %427 : vector<8x128xf32>
    %429 = vector.extract_strided_slice %0 {offsets = [0, 9], sizes = [8, 1], strides = [1, 1]} : vector<8x16xi32> to vector<8x1xi32>
    %430 = vector.broadcast %429 : vector<8x1xi32> to vector<8x128xi32>
    %431 = vector.broadcast %364 : vector<1x128xi32> to vector<8x128xi32>
    %432 = arith.cmpi eq, %430, %431 : vector<8x128xi32>
    %433 = arith.extui %432 : vector<8x128xi1> to vector<8x128xi32>
    %434 = arith.sitofp %433 : vector<8x128xi32> to vector<8x128xf32>
    %435 = arith.addf %428, %434 : vector<8x128xf32>
    %436 = vector.extract_strided_slice %0 {offsets = [0, 10], sizes = [8, 1], strides = [1, 1]} : vector<8x16xi32> to vector<8x1xi32>
    %437 = vector.broadcast %436 : vector<8x1xi32> to vector<8x128xi32>
    %438 = vector.broadcast %364 : vector<1x128xi32> to vector<8x128xi32>
    %439 = arith.cmpi eq, %437, %438 : vector<8x128xi32>
    %440 = arith.extui %439 : vector<8x128xi1> to vector<8x128xi32>
    %441 = arith.sitofp %440 : vector<8x128xi32> to vector<8x128xf32>
    %442 = arith.addf %435, %441 : vector<8x128xf32>
    %443 = vector.extract_strided_slice %0 {offsets = [0, 11], sizes = [8, 1], strides = [1, 1]} : vector<8x16xi32> to vector<8x1xi32>
    %444 = vector.broadcast %443 : vector<8x1xi32> to vector<8x128xi32>
    %445 = vector.broadcast %364 : vector<1x128xi32> to vector<8x128xi32>
    %446 = arith.cmpi eq, %444, %445 : vector<8x128xi32>
    %447 = arith.extui %446 : vector<8x128xi1> to vector<8x128xi32>
    %448 = arith.sitofp %447 : vector<8x128xi32> to vector<8x128xf32>
    %449 = arith.addf %442, %448 : vector<8x128xf32>
    %450 = vector.extract_strided_slice %0 {offsets = [0, 12], sizes = [8, 1], strides = [1, 1]} : vector<8x16xi32> to vector<8x1xi32>
    %451 = vector.broadcast %450 : vector<8x1xi32> to vector<8x128xi32>
    %452 = vector.broadcast %364 : vector<1x128xi32> to vector<8x128xi32>
    %453 = arith.cmpi eq, %451, %452 : vector<8x128xi32>
    %454 = arith.extui %453 : vector<8x128xi1> to vector<8x128xi32>
    %455 = arith.sitofp %454 : vector<8x128xi32> to vector<8x128xf32>
    %456 = arith.addf %449, %455 : vector<8x128xf32>
    %457 = vector.extract_strided_slice %0 {offsets = [0, 13], sizes = [8, 1], strides = [1, 1]} : vector<8x16xi32> to vector<8x1xi32>
    %458 = vector.broadcast %457 : vector<8x1xi32> to vector<8x128xi32>
    %459 = vector.broadcast %364 : vector<1x128xi32> to vector<8x128xi32>
    %460 = arith.cmpi eq, %458, %459 : vector<8x128xi32>
    %461 = arith.extui %460 : vector<8x128xi1> to vector<8x128xi32>
    %462 = arith.sitofp %461 : vector<8x128xi32> to vector<8x128xf32>
    %463 = arith.addf %456, %462 : vector<8x128xf32>
    %464 = vector.extract_strided_slice %0 {offsets = [0, 14], sizes = [8, 1], strides = [1, 1]} : vector<8x16xi32> to vector<8x1xi32>
    %465 = vector.broadcast %464 : vector<8x1xi32> to vector<8x128xi32>
    %466 = vector.broadcast %364 : vector<1x128xi32> to vector<8x128xi32>
    %467 = arith.cmpi eq, %465, %466 : vector<8x128xi32>
    %468 = arith.extui %467 : vector<8x128xi1> to vector<8x128xi32>
    %469 = arith.sitofp %468 : vector<8x128xi32> to vector<8x128xf32>
    %470 = arith.addf %463, %469 : vector<8x128xf32>
    %471 = vector.extract_strided_slice %0 {offsets = [0, 15], sizes = [8, 1], strides = [1, 1]} : vector<8x16xi32> to vector<8x1xi32>
    %472 = vector.broadcast %471 : vector<8x1xi32> to vector<8x128xi32>
    %473 = vector.broadcast %364 : vector<1x128xi32> to vector<8x128xi32>
    %474 = arith.cmpi eq, %472, %473 : vector<8x128xi32>
    %475 = arith.extui %474 : vector<8x128xi1> to vector<8x128xi32>
    %476 = arith.sitofp %475 : vector<8x128xi32> to vector<8x128xf32>
    %477 = arith.addf %470, %476 : vector<8x128xf32>
    %478 = arith.truncf %477 : vector<8x128xf32> to vector<8x128xbf16>
    %c384 = arith.constant 384 : index
    %c0_12 = arith.constant 0 : index
    %479 = vector.load %arg2[%c384, %c0_12] : memref<1024x256xbf16, #tpu.memory_space<vmem>>, vector<128x256xbf16>
    %cst_13 = arith.constant dense<0.000000e+00> : vector<8x256xf32>
    %480 = tpu.matmul %478, %479, %cst_13 {dimension_numbers = #tpu.dot_dimension_numbers<[1], [0], [0], [1], [0, 0, 1, 1], [], []>} : vector<8x128xbf16>, vector<128x256xbf16>, vector<8x256xf32> -> vector<8x256xf32>
    %481 = arith.addf %361, %480 : vector<8x256xf32>
    %482 = tpu.iota {dimensions = array<i32: 1>} : vector<1x128xi32>
    %c512_i32 = arith.constant 512 : i32
    %483 = vector.broadcast %c512_i32 : i32 to vector<1x128xi32>
    %484 = arith.addi %482, %483 : vector<1x128xi32>
    %cst_14 = arith.constant 0.000000e+00 : f32
    %485 = vector.broadcast %cst_14 : f32 to vector<8x128xf32>
    %486 = vector.extract_strided_slice %0 {offsets = [0, 0], sizes = [8, 1], strides = [1, 1]} : vector<8x16xi32> to vector<8x1xi32>
    %487 = vector.broadcast %486 : vector<8x1xi32> to vector<8x128xi32>
    %488 = vector.broadcast %484 : vector<1x128xi32> to vector<8x128xi32>
    %489 = arith.cmpi eq, %487, %488 : vector<8x128xi32>
    %490 = arith.extui %489 : vector<8x128xi1> to vector<8x128xi32>
    %491 = arith.sitofp %490 : vector<8x128xi32> to vector<8x128xf32>
    %492 = arith.addf %485, %491 : vector<8x128xf32>
    %493 = vector.extract_strided_slice %0 {offsets = [0, 1], sizes = [8, 1], strides = [1, 1]} : vector<8x16xi32> to vector<8x1xi32>
    %494 = vector.broadcast %493 : vector<8x1xi32> to vector<8x128xi32>
    %495 = vector.broadcast %484 : vector<1x128xi32> to vector<8x128xi32>
    %496 = arith.cmpi eq, %494, %495 : vector<8x128xi32>
    %497 = arith.extui %496 : vector<8x128xi1> to vector<8x128xi32>
    %498 = arith.sitofp %497 : vector<8x128xi32> to vector<8x128xf32>
    %499 = arith.addf %492, %498 : vector<8x128xf32>
    %500 = vector.extract_strided_slice %0 {offsets = [0, 2], sizes = [8, 1], strides = [1, 1]} : vector<8x16xi32> to vector<8x1xi32>
    %501 = vector.broadcast %500 : vector<8x1xi32> to vector<8x128xi32>
    %502 = vector.broadcast %484 : vector<1x128xi32> to vector<8x128xi32>
    %503 = arith.cmpi eq, %501, %502 : vector<8x128xi32>
    %504 = arith.extui %503 : vector<8x128xi1> to vector<8x128xi32>
    %505 = arith.sitofp %504 : vector<8x128xi32> to vector<8x128xf32>
    %506 = arith.addf %499, %505 : vector<8x128xf32>
    %507 = vector.extract_strided_slice %0 {offsets = [0, 3], sizes = [8, 1], strides = [1, 1]} : vector<8x16xi32> to vector<8x1xi32>
    %508 = vector.broadcast %507 : vector<8x1xi32> to vector<8x128xi32>
    %509 = vector.broadcast %484 : vector<1x128xi32> to vector<8x128xi32>
    %510 = arith.cmpi eq, %508, %509 : vector<8x128xi32>
    %511 = arith.extui %510 : vector<8x128xi1> to vector<8x128xi32>
    %512 = arith.sitofp %511 : vector<8x128xi32> to vector<8x128xf32>
    %513 = arith.addf %506, %512 : vector<8x128xf32>
    %514 = vector.extract_strided_slice %0 {offsets = [0, 4], sizes = [8, 1], strides = [1, 1]} : vector<8x16xi32> to vector<8x1xi32>
    %515 = vector.broadcast %514 : vector<8x1xi32> to vector<8x128xi32>
    %516 = vector.broadcast %484 : vector<1x128xi32> to vector<8x128xi32>
    %517 = arith.cmpi eq, %515, %516 : vector<8x128xi32>
    %518 = arith.extui %517 : vector<8x128xi1> to vector<8x128xi32>
    %519 = arith.sitofp %518 : vector<8x128xi32> to vector<8x128xf32>
    %520 = arith.addf %513, %519 : vector<8x128xf32>
    %521 = vector.extract_strided_slice %0 {offsets = [0, 5], sizes = [8, 1], strides = [1, 1]} : vector<8x16xi32> to vector<8x1xi32>
    %522 = vector.broadcast %521 : vector<8x1xi32> to vector<8x128xi32>
    %523 = vector.broadcast %484 : vector<1x128xi32> to vector<8x128xi32>
    %524 = arith.cmpi eq, %522, %523 : vector<8x128xi32>
    %525 = arith.extui %524 : vector<8x128xi1> to vector<8x128xi32>
    %526 = arith.sitofp %525 : vector<8x128xi32> to vector<8x128xf32>
    %527 = arith.addf %520, %526 : vector<8x128xf32>
    %528 = vector.extract_strided_slice %0 {offsets = [0, 6], sizes = [8, 1], strides = [1, 1]} : vector<8x16xi32> to vector<8x1xi32>
    %529 = vector.broadcast %528 : vector<8x1xi32> to vector<8x128xi32>
    %530 = vector.broadcast %484 : vector<1x128xi32> to vector<8x128xi32>
    %531 = arith.cmpi eq, %529, %530 : vector<8x128xi32>
    %532 = arith.extui %531 : vector<8x128xi1> to vector<8x128xi32>
    %533 = arith.sitofp %532 : vector<8x128xi32> to vector<8x128xf32>
    %534 = arith.addf %527, %533 : vector<8x128xf32>
    %535 = vector.extract_strided_slice %0 {offsets = [0, 7], sizes = [8, 1], strides = [1, 1]} : vector<8x16xi32> to vector<8x1xi32>
    %536 = vector.broadcast %535 : vector<8x1xi32> to vector<8x128xi32>
    %537 = vector.broadcast %484 : vector<1x128xi32> to vector<8x128xi32>
    %538 = arith.cmpi eq, %536, %537 : vector<8x128xi32>
    %539 = arith.extui %538 : vector<8x128xi1> to vector<8x128xi32>
    %540 = arith.sitofp %539 : vector<8x128xi32> to vector<8x128xf32>
    %541 = arith.addf %534, %540 : vector<8x128xf32>
    %542 = vector.extract_strided_slice %0 {offsets = [0, 8], sizes = [8, 1], strides = [1, 1]} : vector<8x16xi32> to vector<8x1xi32>
    %543 = vector.broadcast %542 : vector<8x1xi32> to vector<8x128xi32>
    %544 = vector.broadcast %484 : vector<1x128xi32> to vector<8x128xi32>
    %545 = arith.cmpi eq, %543, %544 : vector<8x128xi32>
    %546 = arith.extui %545 : vector<8x128xi1> to vector<8x128xi32>
    %547 = arith.sitofp %546 : vector<8x128xi32> to vector<8x128xf32>
    %548 = arith.addf %541, %547 : vector<8x128xf32>
    %549 = vector.extract_strided_slice %0 {offsets = [0, 9], sizes = [8, 1], strides = [1, 1]} : vector<8x16xi32> to vector<8x1xi32>
    %550 = vector.broadcast %549 : vector<8x1xi32> to vector<8x128xi32>
    %551 = vector.broadcast %484 : vector<1x128xi32> to vector<8x128xi32>
    %552 = arith.cmpi eq, %550, %551 : vector<8x128xi32>
    %553 = arith.extui %552 : vector<8x128xi1> to vector<8x128xi32>
    %554 = arith.sitofp %553 : vector<8x128xi32> to vector<8x128xf32>
    %555 = arith.addf %548, %554 : vector<8x128xf32>
    %556 = vector.extract_strided_slice %0 {offsets = [0, 10], sizes = [8, 1], strides = [1, 1]} : vector<8x16xi32> to vector<8x1xi32>
    %557 = vector.broadcast %556 : vector<8x1xi32> to vector<8x128xi32>
    %558 = vector.broadcast %484 : vector<1x128xi32> to vector<8x128xi32>
    %559 = arith.cmpi eq, %557, %558 : vector<8x128xi32>
    %560 = arith.extui %559 : vector<8x128xi1> to vector<8x128xi32>
    %561 = arith.sitofp %560 : vector<8x128xi32> to vector<8x128xf32>
    %562 = arith.addf %555, %561 : vector<8x128xf32>
    %563 = vector.extract_strided_slice %0 {offsets = [0, 11], sizes = [8, 1], strides = [1, 1]} : vector<8x16xi32> to vector<8x1xi32>
    %564 = vector.broadcast %563 : vector<8x1xi32> to vector<8x128xi32>
    %565 = vector.broadcast %484 : vector<1x128xi32> to vector<8x128xi32>
    %566 = arith.cmpi eq, %564, %565 : vector<8x128xi32>
    %567 = arith.extui %566 : vector<8x128xi1> to vector<8x128xi32>
    %568 = arith.sitofp %567 : vector<8x128xi32> to vector<8x128xf32>
    %569 = arith.addf %562, %568 : vector<8x128xf32>
    %570 = vector.extract_strided_slice %0 {offsets = [0, 12], sizes = [8, 1], strides = [1, 1]} : vector<8x16xi32> to vector<8x1xi32>
    %571 = vector.broadcast %570 : vector<8x1xi32> to vector<8x128xi32>
    %572 = vector.broadcast %484 : vector<1x128xi32> to vector<8x128xi32>
    %573 = arith.cmpi eq, %571, %572 : vector<8x128xi32>
    %574 = arith.extui %573 : vector<8x128xi1> to vector<8x128xi32>
    %575 = arith.sitofp %574 : vector<8x128xi32> to vector<8x128xf32>
    %576 = arith.addf %569, %575 : vector<8x128xf32>
    %577 = vector.extract_strided_slice %0 {offsets = [0, 13], sizes = [8, 1], strides = [1, 1]} : vector<8x16xi32> to vector<8x1xi32>
    %578 = vector.broadcast %577 : vector<8x1xi32> to vector<8x128xi32>
    %579 = vector.broadcast %484 : vector<1x128xi32> to vector<8x128xi32>
    %580 = arith.cmpi eq, %578, %579 : vector<8x128xi32>
    %581 = arith.extui %580 : vector<8x128xi1> to vector<8x128xi32>
    %582 = arith.sitofp %581 : vector<8x128xi32> to vector<8x128xf32>
    %583 = arith.addf %576, %582 : vector<8x128xf32>
    %584 = vector.extract_strided_slice %0 {offsets = [0, 14], sizes = [8, 1], strides = [1, 1]} : vector<8x16xi32> to vector<8x1xi32>
    %585 = vector.broadcast %584 : vector<8x1xi32> to vector<8x128xi32>
    %586 = vector.broadcast %484 : vector<1x128xi32> to vector<8x128xi32>
    %587 = arith.cmpi eq, %585, %586 : vector<8x128xi32>
    %588 = arith.extui %587 : vector<8x128xi1> to vector<8x128xi32>
    %589 = arith.sitofp %588 : vector<8x128xi32> to vector<8x128xf32>
    %590 = arith.addf %583, %589 : vector<8x128xf32>
    %591 = vector.extract_strided_slice %0 {offsets = [0, 15], sizes = [8, 1], strides = [1, 1]} : vector<8x16xi32> to vector<8x1xi32>
    %592 = vector.broadcast %591 : vector<8x1xi32> to vector<8x128xi32>
    %593 = vector.broadcast %484 : vector<1x128xi32> to vector<8x128xi32>
    %594 = arith.cmpi eq, %592, %593 : vector<8x128xi32>
    %595 = arith.extui %594 : vector<8x128xi1> to vector<8x128xi32>
    %596 = arith.sitofp %595 : vector<8x128xi32> to vector<8x128xf32>
    %597 = arith.addf %590, %596 : vector<8x128xf32>
    %598 = arith.truncf %597 : vector<8x128xf32> to vector<8x128xbf16>
    %c512 = arith.constant 512 : index
    %c0_15 = arith.constant 0 : index
    %599 = vector.load %arg2[%c512, %c0_15] : memref<1024x256xbf16, #tpu.memory_space<vmem>>, vector<128x256xbf16>
    %cst_16 = arith.constant dense<0.000000e+00> : vector<8x256xf32>
    %600 = tpu.matmul %598, %599, %cst_16 {dimension_numbers = #tpu.dot_dimension_numbers<[1], [0], [0], [1], [0, 0, 1, 1], [], []>} : vector<8x128xbf16>, vector<128x256xbf16>, vector<8x256xf32> -> vector<8x256xf32>
    %601 = arith.addf %481, %600 : vector<8x256xf32>
    %602 = tpu.iota {dimensions = array<i32: 1>} : vector<1x128xi32>
    %c640_i32 = arith.constant 640 : i32
    %603 = vector.broadcast %c640_i32 : i32 to vector<1x128xi32>
    %604 = arith.addi %602, %603 : vector<1x128xi32>
    %cst_17 = arith.constant 0.000000e+00 : f32
    %605 = vector.broadcast %cst_17 : f32 to vector<8x128xf32>
    %606 = vector.extract_strided_slice %0 {offsets = [0, 0], sizes = [8, 1], strides = [1, 1]} : vector<8x16xi32> to vector<8x1xi32>
    %607 = vector.broadcast %606 : vector<8x1xi32> to vector<8x128xi32>
    %608 = vector.broadcast %604 : vector<1x128xi32> to vector<8x128xi32>
    %609 = arith.cmpi eq, %607, %608 : vector<8x128xi32>
    %610 = arith.extui %609 : vector<8x128xi1> to vector<8x128xi32>
    %611 = arith.sitofp %610 : vector<8x128xi32> to vector<8x128xf32>
    %612 = arith.addf %605, %611 : vector<8x128xf32>
    %613 = vector.extract_strided_slice %0 {offsets = [0, 1], sizes = [8, 1], strides = [1, 1]} : vector<8x16xi32> to vector<8x1xi32>
    %614 = vector.broadcast %613 : vector<8x1xi32> to vector<8x128xi32>
    %615 = vector.broadcast %604 : vector<1x128xi32> to vector<8x128xi32>
    %616 = arith.cmpi eq, %614, %615 : vector<8x128xi32>
    %617 = arith.extui %616 : vector<8x128xi1> to vector<8x128xi32>
    %618 = arith.sitofp %617 : vector<8x128xi32> to vector<8x128xf32>
    %619 = arith.addf %612, %618 : vector<8x128xf32>
    %620 = vector.extract_strided_slice %0 {offsets = [0, 2], sizes = [8, 1], strides = [1, 1]} : vector<8x16xi32> to vector<8x1xi32>
    %621 = vector.broadcast %620 : vector<8x1xi32> to vector<8x128xi32>
    %622 = vector.broadcast %604 : vector<1x128xi32> to vector<8x128xi32>
    %623 = arith.cmpi eq, %621, %622 : vector<8x128xi32>
    %624 = arith.extui %623 : vector<8x128xi1> to vector<8x128xi32>
    %625 = arith.sitofp %624 : vector<8x128xi32> to vector<8x128xf32>
    %626 = arith.addf %619, %625 : vector<8x128xf32>
    %627 = vector.extract_strided_slice %0 {offsets = [0, 3], sizes = [8, 1], strides = [1, 1]} : vector<8x16xi32> to vector<8x1xi32>
    %628 = vector.broadcast %627 : vector<8x1xi32> to vector<8x128xi32>
    %629 = vector.broadcast %604 : vector<1x128xi32> to vector<8x128xi32>
    %630 = arith.cmpi eq, %628, %629 : vector<8x128xi32>
    %631 = arith.extui %630 : vector<8x128xi1> to vector<8x128xi32>
    %632 = arith.sitofp %631 : vector<8x128xi32> to vector<8x128xf32>
    %633 = arith.addf %626, %632 : vector<8x128xf32>
    %634 = vector.extract_strided_slice %0 {offsets = [0, 4], sizes = [8, 1], strides = [1, 1]} : vector<8x16xi32> to vector<8x1xi32>
    %635 = vector.broadcast %634 : vector<8x1xi32> to vector<8x128xi32>
    %636 = vector.broadcast %604 : vector<1x128xi32> to vector<8x128xi32>
    %637 = arith.cmpi eq, %635, %636 : vector<8x128xi32>
    %638 = arith.extui %637 : vector<8x128xi1> to vector<8x128xi32>
    %639 = arith.sitofp %638 : vector<8x128xi32> to vector<8x128xf32>
    %640 = arith.addf %633, %639 : vector<8x128xf32>
    %641 = vector.extract_strided_slice %0 {offsets = [0, 5], sizes = [8, 1], strides = [1, 1]} : vector<8x16xi32> to vector<8x1xi32>
    %642 = vector.broadcast %641 : vector<8x1xi32> to vector<8x128xi32>
    %643 = vector.broadcast %604 : vector<1x128xi32> to vector<8x128xi32>
    %644 = arith.cmpi eq, %642, %643 : vector<8x128xi32>
    %645 = arith.extui %644 : vector<8x128xi1> to vector<8x128xi32>
    %646 = arith.sitofp %645 : vector<8x128xi32> to vector<8x128xf32>
    %647 = arith.addf %640, %646 : vector<8x128xf32>
    %648 = vector.extract_strided_slice %0 {offsets = [0, 6], sizes = [8, 1], strides = [1, 1]} : vector<8x16xi32> to vector<8x1xi32>
    %649 = vector.broadcast %648 : vector<8x1xi32> to vector<8x128xi32>
    %650 = vector.broadcast %604 : vector<1x128xi32> to vector<8x128xi32>
    %651 = arith.cmpi eq, %649, %650 : vector<8x128xi32>
    %652 = arith.extui %651 : vector<8x128xi1> to vector<8x128xi32>
    %653 = arith.sitofp %652 : vector<8x128xi32> to vector<8x128xf32>
    %654 = arith.addf %647, %653 : vector<8x128xf32>
    %655 = vector.extract_strided_slice %0 {offsets = [0, 7], sizes = [8, 1], strides = [1, 1]} : vector<8x16xi32> to vector<8x1xi32>
    %656 = vector.broadcast %655 : vector<8x1xi32> to vector<8x128xi32>
    %657 = vector.broadcast %604 : vector<1x128xi32> to vector<8x128xi32>
    %658 = arith.cmpi eq, %656, %657 : vector<8x128xi32>
    %659 = arith.extui %658 : vector<8x128xi1> to vector<8x128xi32>
    %660 = arith.sitofp %659 : vector<8x128xi32> to vector<8x128xf32>
    %661 = arith.addf %654, %660 : vector<8x128xf32>
    %662 = vector.extract_strided_slice %0 {offsets = [0, 8], sizes = [8, 1], strides = [1, 1]} : vector<8x16xi32> to vector<8x1xi32>
    %663 = vector.broadcast %662 : vector<8x1xi32> to vector<8x128xi32>
    %664 = vector.broadcast %604 : vector<1x128xi32> to vector<8x128xi32>
    %665 = arith.cmpi eq, %663, %664 : vector<8x128xi32>
    %666 = arith.extui %665 : vector<8x128xi1> to vector<8x128xi32>
    %667 = arith.sitofp %666 : vector<8x128xi32> to vector<8x128xf32>
    %668 = arith.addf %661, %667 : vector<8x128xf32>
    %669 = vector.extract_strided_slice %0 {offsets = [0, 9], sizes = [8, 1], strides = [1, 1]} : vector<8x16xi32> to vector<8x1xi32>
    %670 = vector.broadcast %669 : vector<8x1xi32> to vector<8x128xi32>
    %671 = vector.broadcast %604 : vector<1x128xi32> to vector<8x128xi32>
    %672 = arith.cmpi eq, %670, %671 : vector<8x128xi32>
    %673 = arith.extui %672 : vector<8x128xi1> to vector<8x128xi32>
    %674 = arith.sitofp %673 : vector<8x128xi32> to vector<8x128xf32>
    %675 = arith.addf %668, %674 : vector<8x128xf32>
    %676 = vector.extract_strided_slice %0 {offsets = [0, 10], sizes = [8, 1], strides = [1, 1]} : vector<8x16xi32> to vector<8x1xi32>
    %677 = vector.broadcast %676 : vector<8x1xi32> to vector<8x128xi32>
    %678 = vector.broadcast %604 : vector<1x128xi32> to vector<8x128xi32>
    %679 = arith.cmpi eq, %677, %678 : vector<8x128xi32>
    %680 = arith.extui %679 : vector<8x128xi1> to vector<8x128xi32>
    %681 = arith.sitofp %680 : vector<8x128xi32> to vector<8x128xf32>
    %682 = arith.addf %675, %681 : vector<8x128xf32>
    %683 = vector.extract_strided_slice %0 {offsets = [0, 11], sizes = [8, 1], strides = [1, 1]} : vector<8x16xi32> to vector<8x1xi32>
    %684 = vector.broadcast %683 : vector<8x1xi32> to vector<8x128xi32>
    %685 = vector.broadcast %604 : vector<1x128xi32> to vector<8x128xi32>
    %686 = arith.cmpi eq, %684, %685 : vector<8x128xi32>
    %687 = arith.extui %686 : vector<8x128xi1> to vector<8x128xi32>
    %688 = arith.sitofp %687 : vector<8x128xi32> to vector<8x128xf32>
    %689 = arith.addf %682, %688 : vector<8x128xf32>
    %690 = vector.extract_strided_slice %0 {offsets = [0, 12], sizes = [8, 1], strides = [1, 1]} : vector<8x16xi32> to vector<8x1xi32>
    %691 = vector.broadcast %690 : vector<8x1xi32> to vector<8x128xi32>
    %692 = vector.broadcast %604 : vector<1x128xi32> to vector<8x128xi32>
    %693 = arith.cmpi eq, %691, %692 : vector<8x128xi32>
    %694 = arith.extui %693 : vector<8x128xi1> to vector<8x128xi32>
    %695 = arith.sitofp %694 : vector<8x128xi32> to vector<8x128xf32>
    %696 = arith.addf %689, %695 : vector<8x128xf32>
    %697 = vector.extract_strided_slice %0 {offsets = [0, 13], sizes = [8, 1], strides = [1, 1]} : vector<8x16xi32> to vector<8x1xi32>
    %698 = vector.broadcast %697 : vector<8x1xi32> to vector<8x128xi32>
    %699 = vector.broadcast %604 : vector<1x128xi32> to vector<8x128xi32>
    %700 = arith.cmpi eq, %698, %699 : vector<8x128xi32>
    %701 = arith.extui %700 : vector<8x128xi1> to vector<8x128xi32>
    %702 = arith.sitofp %701 : vector<8x128xi32> to vector<8x128xf32>
    %703 = arith.addf %696, %702 : vector<8x128xf32>
    %704 = vector.extract_strided_slice %0 {offsets = [0, 14], sizes = [8, 1], strides = [1, 1]} : vector<8x16xi32> to vector<8x1xi32>
    %705 = vector.broadcast %704 : vector<8x1xi32> to vector<8x128xi32>
    %706 = vector.broadcast %604 : vector<1x128xi32> to vector<8x128xi32>
    %707 = arith.cmpi eq, %705, %706 : vector<8x128xi32>
    %708 = arith.extui %707 : vector<8x128xi1> to vector<8x128xi32>
    %709 = arith.sitofp %708 : vector<8x128xi32> to vector<8x128xf32>
    %710 = arith.addf %703, %709 : vector<8x128xf32>
    %711 = vector.extract_strided_slice %0 {offsets = [0, 15], sizes = [8, 1], strides = [1, 1]} : vector<8x16xi32> to vector<8x1xi32>
    %712 = vector.broadcast %711 : vector<8x1xi32> to vector<8x128xi32>
    %713 = vector.broadcast %604 : vector<1x128xi32> to vector<8x128xi32>
    %714 = arith.cmpi eq, %712, %713 : vector<8x128xi32>
    %715 = arith.extui %714 : vector<8x128xi1> to vector<8x128xi32>
    %716 = arith.sitofp %715 : vector<8x128xi32> to vector<8x128xf32>
    %717 = arith.addf %710, %716 : vector<8x128xf32>
    %718 = arith.truncf %717 : vector<8x128xf32> to vector<8x128xbf16>
    %c640 = arith.constant 640 : index
    %c0_18 = arith.constant 0 : index
    %719 = vector.load %arg2[%c640, %c0_18] : memref<1024x256xbf16, #tpu.memory_space<vmem>>, vector<128x256xbf16>
    %cst_19 = arith.constant dense<0.000000e+00> : vector<8x256xf32>
    %720 = tpu.matmul %718, %719, %cst_19 {dimension_numbers = #tpu.dot_dimension_numbers<[1], [0], [0], [1], [0, 0, 1, 1], [], []>} : vector<8x128xbf16>, vector<128x256xbf16>, vector<8x256xf32> -> vector<8x256xf32>
    %721 = arith.addf %601, %720 : vector<8x256xf32>
    %722 = tpu.iota {dimensions = array<i32: 1>} : vector<1x128xi32>
    %c768_i32 = arith.constant 768 : i32
    %723 = vector.broadcast %c768_i32 : i32 to vector<1x128xi32>
    %724 = arith.addi %722, %723 : vector<1x128xi32>
    %cst_20 = arith.constant 0.000000e+00 : f32
    %725 = vector.broadcast %cst_20 : f32 to vector<8x128xf32>
    %726 = vector.extract_strided_slice %0 {offsets = [0, 0], sizes = [8, 1], strides = [1, 1]} : vector<8x16xi32> to vector<8x1xi32>
    %727 = vector.broadcast %726 : vector<8x1xi32> to vector<8x128xi32>
    %728 = vector.broadcast %724 : vector<1x128xi32> to vector<8x128xi32>
    %729 = arith.cmpi eq, %727, %728 : vector<8x128xi32>
    %730 = arith.extui %729 : vector<8x128xi1> to vector<8x128xi32>
    %731 = arith.sitofp %730 : vector<8x128xi32> to vector<8x128xf32>
    %732 = arith.addf %725, %731 : vector<8x128xf32>
    %733 = vector.extract_strided_slice %0 {offsets = [0, 1], sizes = [8, 1], strides = [1, 1]} : vector<8x16xi32> to vector<8x1xi32>
    %734 = vector.broadcast %733 : vector<8x1xi32> to vector<8x128xi32>
    %735 = vector.broadcast %724 : vector<1x128xi32> to vector<8x128xi32>
    %736 = arith.cmpi eq, %734, %735 : vector<8x128xi32>
    %737 = arith.extui %736 : vector<8x128xi1> to vector<8x128xi32>
    %738 = arith.sitofp %737 : vector<8x128xi32> to vector<8x128xf32>
    %739 = arith.addf %732, %738 : vector<8x128xf32>
    %740 = vector.extract_strided_slice %0 {offsets = [0, 2], sizes = [8, 1], strides = [1, 1]} : vector<8x16xi32> to vector<8x1xi32>
    %741 = vector.broadcast %740 : vector<8x1xi32> to vector<8x128xi32>
    %742 = vector.broadcast %724 : vector<1x128xi32> to vector<8x128xi32>
    %743 = arith.cmpi eq, %741, %742 : vector<8x128xi32>
    %744 = arith.extui %743 : vector<8x128xi1> to vector<8x128xi32>
    %745 = arith.sitofp %744 : vector<8x128xi32> to vector<8x128xf32>
    %746 = arith.addf %739, %745 : vector<8x128xf32>
    %747 = vector.extract_strided_slice %0 {offsets = [0, 3], sizes = [8, 1], strides = [1, 1]} : vector<8x16xi32> to vector<8x1xi32>
    %748 = vector.broadcast %747 : vector<8x1xi32> to vector<8x128xi32>
    %749 = vector.broadcast %724 : vector<1x128xi32> to vector<8x128xi32>
    %750 = arith.cmpi eq, %748, %749 : vector<8x128xi32>
    %751 = arith.extui %750 : vector<8x128xi1> to vector<8x128xi32>
    %752 = arith.sitofp %751 : vector<8x128xi32> to vector<8x128xf32>
    %753 = arith.addf %746, %752 : vector<8x128xf32>
    %754 = vector.extract_strided_slice %0 {offsets = [0, 4], sizes = [8, 1], strides = [1, 1]} : vector<8x16xi32> to vector<8x1xi32>
    %755 = vector.broadcast %754 : vector<8x1xi32> to vector<8x128xi32>
    %756 = vector.broadcast %724 : vector<1x128xi32> to vector<8x128xi32>
    %757 = arith.cmpi eq, %755, %756 : vector<8x128xi32>
    %758 = arith.extui %757 : vector<8x128xi1> to vector<8x128xi32>
    %759 = arith.sitofp %758 : vector<8x128xi32> to vector<8x128xf32>
    %760 = arith.addf %753, %759 : vector<8x128xf32>
    %761 = vector.extract_strided_slice %0 {offsets = [0, 5], sizes = [8, 1], strides = [1, 1]} : vector<8x16xi32> to vector<8x1xi32>
    %762 = vector.broadcast %761 : vector<8x1xi32> to vector<8x128xi32>
    %763 = vector.broadcast %724 : vector<1x128xi32> to vector<8x128xi32>
    %764 = arith.cmpi eq, %762, %763 : vector<8x128xi32>
    %765 = arith.extui %764 : vector<8x128xi1> to vector<8x128xi32>
    %766 = arith.sitofp %765 : vector<8x128xi32> to vector<8x128xf32>
    %767 = arith.addf %760, %766 : vector<8x128xf32>
    %768 = vector.extract_strided_slice %0 {offsets = [0, 6], sizes = [8, 1], strides = [1, 1]} : vector<8x16xi32> to vector<8x1xi32>
    %769 = vector.broadcast %768 : vector<8x1xi32> to vector<8x128xi32>
    %770 = vector.broadcast %724 : vector<1x128xi32> to vector<8x128xi32>
    %771 = arith.cmpi eq, %769, %770 : vector<8x128xi32>
    %772 = arith.extui %771 : vector<8x128xi1> to vector<8x128xi32>
    %773 = arith.sitofp %772 : vector<8x128xi32> to vector<8x128xf32>
    %774 = arith.addf %767, %773 : vector<8x128xf32>
    %775 = vector.extract_strided_slice %0 {offsets = [0, 7], sizes = [8, 1], strides = [1, 1]} : vector<8x16xi32> to vector<8x1xi32>
    %776 = vector.broadcast %775 : vector<8x1xi32> to vector<8x128xi32>
    %777 = vector.broadcast %724 : vector<1x128xi32> to vector<8x128xi32>
    %778 = arith.cmpi eq, %776, %777 : vector<8x128xi32>
    %779 = arith.extui %778 : vector<8x128xi1> to vector<8x128xi32>
    %780 = arith.sitofp %779 : vector<8x128xi32> to vector<8x128xf32>
    %781 = arith.addf %774, %780 : vector<8x128xf32>
    %782 = vector.extract_strided_slice %0 {offsets = [0, 8], sizes = [8, 1], strides = [1, 1]} : vector<8x16xi32> to vector<8x1xi32>
    %783 = vector.broadcast %782 : vector<8x1xi32> to vector<8x128xi32>
    %784 = vector.broadcast %724 : vector<1x128xi32> to vector<8x128xi32>
    %785 = arith.cmpi eq, %783, %784 : vector<8x128xi32>
    %786 = arith.extui %785 : vector<8x128xi1> to vector<8x128xi32>
    %787 = arith.sitofp %786 : vector<8x128xi32> to vector<8x128xf32>
    %788 = arith.addf %781, %787 : vector<8x128xf32>
    %789 = vector.extract_strided_slice %0 {offsets = [0, 9], sizes = [8, 1], strides = [1, 1]} : vector<8x16xi32> to vector<8x1xi32>
    %790 = vector.broadcast %789 : vector<8x1xi32> to vector<8x128xi32>
    %791 = vector.broadcast %724 : vector<1x128xi32> to vector<8x128xi32>
    %792 = arith.cmpi eq, %790, %791 : vector<8x128xi32>
    %793 = arith.extui %792 : vector<8x128xi1> to vector<8x128xi32>
    %794 = arith.sitofp %793 : vector<8x128xi32> to vector<8x128xf32>
    %795 = arith.addf %788, %794 : vector<8x128xf32>
    %796 = vector.extract_strided_slice %0 {offsets = [0, 10], sizes = [8, 1], strides = [1, 1]} : vector<8x16xi32> to vector<8x1xi32>
    %797 = vector.broadcast %796 : vector<8x1xi32> to vector<8x128xi32>
    %798 = vector.broadcast %724 : vector<1x128xi32> to vector<8x128xi32>
    %799 = arith.cmpi eq, %797, %798 : vector<8x128xi32>
    %800 = arith.extui %799 : vector<8x128xi1> to vector<8x128xi32>
    %801 = arith.sitofp %800 : vector<8x128xi32> to vector<8x128xf32>
    %802 = arith.addf %795, %801 : vector<8x128xf32>
    %803 = vector.extract_strided_slice %0 {offsets = [0, 11], sizes = [8, 1], strides = [1, 1]} : vector<8x16xi32> to vector<8x1xi32>
    %804 = vector.broadcast %803 : vector<8x1xi32> to vector<8x128xi32>
    %805 = vector.broadcast %724 : vector<1x128xi32> to vector<8x128xi32>
    %806 = arith.cmpi eq, %804, %805 : vector<8x128xi32>
    %807 = arith.extui %806 : vector<8x128xi1> to vector<8x128xi32>
    %808 = arith.sitofp %807 : vector<8x128xi32> to vector<8x128xf32>
    %809 = arith.addf %802, %808 : vector<8x128xf32>
    %810 = vector.extract_strided_slice %0 {offsets = [0, 12], sizes = [8, 1], strides = [1, 1]} : vector<8x16xi32> to vector<8x1xi32>
    %811 = vector.broadcast %810 : vector<8x1xi32> to vector<8x128xi32>
    %812 = vector.broadcast %724 : vector<1x128xi32> to vector<8x128xi32>
    %813 = arith.cmpi eq, %811, %812 : vector<8x128xi32>
    %814 = arith.extui %813 : vector<8x128xi1> to vector<8x128xi32>
    %815 = arith.sitofp %814 : vector<8x128xi32> to vector<8x128xf32>
    %816 = arith.addf %809, %815 : vector<8x128xf32>
    %817 = vector.extract_strided_slice %0 {offsets = [0, 13], sizes = [8, 1], strides = [1, 1]} : vector<8x16xi32> to vector<8x1xi32>
    %818 = vector.broadcast %817 : vector<8x1xi32> to vector<8x128xi32>
    %819 = vector.broadcast %724 : vector<1x128xi32> to vector<8x128xi32>
    %820 = arith.cmpi eq, %818, %819 : vector<8x128xi32>
    %821 = arith.extui %820 : vector<8x128xi1> to vector<8x128xi32>
    %822 = arith.sitofp %821 : vector<8x128xi32> to vector<8x128xf32>
    %823 = arith.addf %816, %822 : vector<8x128xf32>
    %824 = vector.extract_strided_slice %0 {offsets = [0, 14], sizes = [8, 1], strides = [1, 1]} : vector<8x16xi32> to vector<8x1xi32>
    %825 = vector.broadcast %824 : vector<8x1xi32> to vector<8x128xi32>
    %826 = vector.broadcast %724 : vector<1x128xi32> to vector<8x128xi32>
    %827 = arith.cmpi eq, %825, %826 : vector<8x128xi32>
    %828 = arith.extui %827 : vector<8x128xi1> to vector<8x128xi32>
    %829 = arith.sitofp %828 : vector<8x128xi32> to vector<8x128xf32>
    %830 = arith.addf %823, %829 : vector<8x128xf32>
    %831 = vector.extract_strided_slice %0 {offsets = [0, 15], sizes = [8, 1], strides = [1, 1]} : vector<8x16xi32> to vector<8x1xi32>
    %832 = vector.broadcast %831 : vector<8x1xi32> to vector<8x128xi32>
    %833 = vector.broadcast %724 : vector<1x128xi32> to vector<8x128xi32>
    %834 = arith.cmpi eq, %832, %833 : vector<8x128xi32>
    %835 = arith.extui %834 : vector<8x128xi1> to vector<8x128xi32>
    %836 = arith.sitofp %835 : vector<8x128xi32> to vector<8x128xf32>
    %837 = arith.addf %830, %836 : vector<8x128xf32>
    %838 = arith.truncf %837 : vector<8x128xf32> to vector<8x128xbf16>
    %c768 = arith.constant 768 : index
    %c0_21 = arith.constant 0 : index
    %839 = vector.load %arg2[%c768, %c0_21] : memref<1024x256xbf16, #tpu.memory_space<vmem>>, vector<128x256xbf16>
    %cst_22 = arith.constant dense<0.000000e+00> : vector<8x256xf32>
    %840 = tpu.matmul %838, %839, %cst_22 {dimension_numbers = #tpu.dot_dimension_numbers<[1], [0], [0], [1], [0, 0, 1, 1], [], []>} : vector<8x128xbf16>, vector<128x256xbf16>, vector<8x256xf32> -> vector<8x256xf32>
    %841 = arith.addf %721, %840 : vector<8x256xf32>
    %842 = tpu.iota {dimensions = array<i32: 1>} : vector<1x128xi32>
    %c896_i32 = arith.constant 896 : i32
    %843 = vector.broadcast %c896_i32 : i32 to vector<1x128xi32>
    %844 = arith.addi %842, %843 : vector<1x128xi32>
    %cst_23 = arith.constant 0.000000e+00 : f32
    %845 = vector.broadcast %cst_23 : f32 to vector<8x128xf32>
    %846 = vector.extract_strided_slice %0 {offsets = [0, 0], sizes = [8, 1], strides = [1, 1]} : vector<8x16xi32> to vector<8x1xi32>
    %847 = vector.broadcast %846 : vector<8x1xi32> to vector<8x128xi32>
    %848 = vector.broadcast %844 : vector<1x128xi32> to vector<8x128xi32>
    %849 = arith.cmpi eq, %847, %848 : vector<8x128xi32>
    %850 = arith.extui %849 : vector<8x128xi1> to vector<8x128xi32>
    %851 = arith.sitofp %850 : vector<8x128xi32> to vector<8x128xf32>
    %852 = arith.addf %845, %851 : vector<8x128xf32>
    %853 = vector.extract_strided_slice %0 {offsets = [0, 1], sizes = [8, 1], strides = [1, 1]} : vector<8x16xi32> to vector<8x1xi32>
    %854 = vector.broadcast %853 : vector<8x1xi32> to vector<8x128xi32>
    %855 = vector.broadcast %844 : vector<1x128xi32> to vector<8x128xi32>
    %856 = arith.cmpi eq, %854, %855 : vector<8x128xi32>
    %857 = arith.extui %856 : vector<8x128xi1> to vector<8x128xi32>
    %858 = arith.sitofp %857 : vector<8x128xi32> to vector<8x128xf32>
    %859 = arith.addf %852, %858 : vector<8x128xf32>
    %860 = vector.extract_strided_slice %0 {offsets = [0, 2], sizes = [8, 1], strides = [1, 1]} : vector<8x16xi32> to vector<8x1xi32>
    %861 = vector.broadcast %860 : vector<8x1xi32> to vector<8x128xi32>
    %862 = vector.broadcast %844 : vector<1x128xi32> to vector<8x128xi32>
    %863 = arith.cmpi eq, %861, %862 : vector<8x128xi32>
    %864 = arith.extui %863 : vector<8x128xi1> to vector<8x128xi32>
    %865 = arith.sitofp %864 : vector<8x128xi32> to vector<8x128xf32>
    %866 = arith.addf %859, %865 : vector<8x128xf32>
    %867 = vector.extract_strided_slice %0 {offsets = [0, 3], sizes = [8, 1], strides = [1, 1]} : vector<8x16xi32> to vector<8x1xi32>
    %868 = vector.broadcast %867 : vector<8x1xi32> to vector<8x128xi32>
    %869 = vector.broadcast %844 : vector<1x128xi32> to vector<8x128xi32>
    %870 = arith.cmpi eq, %868, %869 : vector<8x128xi32>
    %871 = arith.extui %870 : vector<8x128xi1> to vector<8x128xi32>
    %872 = arith.sitofp %871 : vector<8x128xi32> to vector<8x128xf32>
    %873 = arith.addf %866, %872 : vector<8x128xf32>
    %874 = vector.extract_strided_slice %0 {offsets = [0, 4], sizes = [8, 1], strides = [1, 1]} : vector<8x16xi32> to vector<8x1xi32>
    %875 = vector.broadcast %874 : vector<8x1xi32> to vector<8x128xi32>
    %876 = vector.broadcast %844 : vector<1x128xi32> to vector<8x128xi32>
    %877 = arith.cmpi eq, %875, %876 : vector<8x128xi32>
    %878 = arith.extui %877 : vector<8x128xi1> to vector<8x128xi32>
    %879 = arith.sitofp %878 : vector<8x128xi32> to vector<8x128xf32>
    %880 = arith.addf %873, %879 : vector<8x128xf32>
    %881 = vector.extract_strided_slice %0 {offsets = [0, 5], sizes = [8, 1], strides = [1, 1]} : vector<8x16xi32> to vector<8x1xi32>
    %882 = vector.broadcast %881 : vector<8x1xi32> to vector<8x128xi32>
    %883 = vector.broadcast %844 : vector<1x128xi32> to vector<8x128xi32>
    %884 = arith.cmpi eq, %882, %883 : vector<8x128xi32>
    %885 = arith.extui %884 : vector<8x128xi1> to vector<8x128xi32>
    %886 = arith.sitofp %885 : vector<8x128xi32> to vector<8x128xf32>
    %887 = arith.addf %880, %886 : vector<8x128xf32>
    %888 = vector.extract_strided_slice %0 {offsets = [0, 6], sizes = [8, 1], strides = [1, 1]} : vector<8x16xi32> to vector<8x1xi32>
    %889 = vector.broadcast %888 : vector<8x1xi32> to vector<8x128xi32>
    %890 = vector.broadcast %844 : vector<1x128xi32> to vector<8x128xi32>
    %891 = arith.cmpi eq, %889, %890 : vector<8x128xi32>
    %892 = arith.extui %891 : vector<8x128xi1> to vector<8x128xi32>
    %893 = arith.sitofp %892 : vector<8x128xi32> to vector<8x128xf32>
    %894 = arith.addf %887, %893 : vector<8x128xf32>
    %895 = vector.extract_strided_slice %0 {offsets = [0, 7], sizes = [8, 1], strides = [1, 1]} : vector<8x16xi32> to vector<8x1xi32>
    %896 = vector.broadcast %895 : vector<8x1xi32> to vector<8x128xi32>
    %897 = vector.broadcast %844 : vector<1x128xi32> to vector<8x128xi32>
    %898 = arith.cmpi eq, %896, %897 : vector<8x128xi32>
    %899 = arith.extui %898 : vector<8x128xi1> to vector<8x128xi32>
    %900 = arith.sitofp %899 : vector<8x128xi32> to vector<8x128xf32>
    %901 = arith.addf %894, %900 : vector<8x128xf32>
    %902 = vector.extract_strided_slice %0 {offsets = [0, 8], sizes = [8, 1], strides = [1, 1]} : vector<8x16xi32> to vector<8x1xi32>
    %903 = vector.broadcast %902 : vector<8x1xi32> to vector<8x128xi32>
    %904 = vector.broadcast %844 : vector<1x128xi32> to vector<8x128xi32>
    %905 = arith.cmpi eq, %903, %904 : vector<8x128xi32>
    %906 = arith.extui %905 : vector<8x128xi1> to vector<8x128xi32>
    %907 = arith.sitofp %906 : vector<8x128xi32> to vector<8x128xf32>
    %908 = arith.addf %901, %907 : vector<8x128xf32>
    %909 = vector.extract_strided_slice %0 {offsets = [0, 9], sizes = [8, 1], strides = [1, 1]} : vector<8x16xi32> to vector<8x1xi32>
    %910 = vector.broadcast %909 : vector<8x1xi32> to vector<8x128xi32>
    %911 = vector.broadcast %844 : vector<1x128xi32> to vector<8x128xi32>
    %912 = arith.cmpi eq, %910, %911 : vector<8x128xi32>
    %913 = arith.extui %912 : vector<8x128xi1> to vector<8x128xi32>
    %914 = arith.sitofp %913 : vector<8x128xi32> to vector<8x128xf32>
    %915 = arith.addf %908, %914 : vector<8x128xf32>
    %916 = vector.extract_strided_slice %0 {offsets = [0, 10], sizes = [8, 1], strides = [1, 1]} : vector<8x16xi32> to vector<8x1xi32>
    %917 = vector.broadcast %916 : vector<8x1xi32> to vector<8x128xi32>
    %918 = vector.broadcast %844 : vector<1x128xi32> to vector<8x128xi32>
    %919 = arith.cmpi eq, %917, %918 : vector<8x128xi32>
    %920 = arith.extui %919 : vector<8x128xi1> to vector<8x128xi32>
    %921 = arith.sitofp %920 : vector<8x128xi32> to vector<8x128xf32>
    %922 = arith.addf %915, %921 : vector<8x128xf32>
    %923 = vector.extract_strided_slice %0 {offsets = [0, 11], sizes = [8, 1], strides = [1, 1]} : vector<8x16xi32> to vector<8x1xi32>
    %924 = vector.broadcast %923 : vector<8x1xi32> to vector<8x128xi32>
    %925 = vector.broadcast %844 : vector<1x128xi32> to vector<8x128xi32>
    %926 = arith.cmpi eq, %924, %925 : vector<8x128xi32>
    %927 = arith.extui %926 : vector<8x128xi1> to vector<8x128xi32>
    %928 = arith.sitofp %927 : vector<8x128xi32> to vector<8x128xf32>
    %929 = arith.addf %922, %928 : vector<8x128xf32>
    %930 = vector.extract_strided_slice %0 {offsets = [0, 12], sizes = [8, 1], strides = [1, 1]} : vector<8x16xi32> to vector<8x1xi32>
    %931 = vector.broadcast %930 : vector<8x1xi32> to vector<8x128xi32>
    %932 = vector.broadcast %844 : vector<1x128xi32> to vector<8x128xi32>
    %933 = arith.cmpi eq, %931, %932 : vector<8x128xi32>
    %934 = arith.extui %933 : vector<8x128xi1> to vector<8x128xi32>
    %935 = arith.sitofp %934 : vector<8x128xi32> to vector<8x128xf32>
    %936 = arith.addf %929, %935 : vector<8x128xf32>
    %937 = vector.extract_strided_slice %0 {offsets = [0, 13], sizes = [8, 1], strides = [1, 1]} : vector<8x16xi32> to vector<8x1xi32>
    %938 = vector.broadcast %937 : vector<8x1xi32> to vector<8x128xi32>
    %939 = vector.broadcast %844 : vector<1x128xi32> to vector<8x128xi32>
    %940 = arith.cmpi eq, %938, %939 : vector<8x128xi32>
    %941 = arith.extui %940 : vector<8x128xi1> to vector<8x128xi32>
    %942 = arith.sitofp %941 : vector<8x128xi32> to vector<8x128xf32>
    %943 = arith.addf %936, %942 : vector<8x128xf32>
    %944 = vector.extract_strided_slice %0 {offsets = [0, 14], sizes = [8, 1], strides = [1, 1]} : vector<8x16xi32> to vector<8x1xi32>
    %945 = vector.broadcast %944 : vector<8x1xi32> to vector<8x128xi32>
    %946 = vector.broadcast %844 : vector<1x128xi32> to vector<8x128xi32>
    %947 = arith.cmpi eq, %945, %946 : vector<8x128xi32>
    %948 = arith.extui %947 : vector<8x128xi1> to vector<8x128xi32>
    %949 = arith.sitofp %948 : vector<8x128xi32> to vector<8x128xf32>
    %950 = arith.addf %943, %949 : vector<8x128xf32>
    %951 = vector.extract_strided_slice %0 {offsets = [0, 15], sizes = [8, 1], strides = [1, 1]} : vector<8x16xi32> to vector<8x1xi32>
    %952 = vector.broadcast %951 : vector<8x1xi32> to vector<8x128xi32>
    %953 = vector.broadcast %844 : vector<1x128xi32> to vector<8x128xi32>
    %954 = arith.cmpi eq, %952, %953 : vector<8x128xi32>
    %955 = arith.extui %954 : vector<8x128xi1> to vector<8x128xi32>
    %956 = arith.sitofp %955 : vector<8x128xi32> to vector<8x128xf32>
    %957 = arith.addf %950, %956 : vector<8x128xf32>
    %958 = arith.truncf %957 : vector<8x128xf32> to vector<8x128xbf16>
    %c896 = arith.constant 896 : index
    %c0_24 = arith.constant 0 : index
    %959 = vector.load %arg2[%c896, %c0_24] : memref<1024x256xbf16, #tpu.memory_space<vmem>>, vector<128x256xbf16>
    %cst_25 = arith.constant dense<0.000000e+00> : vector<8x256xf32>
    %960 = tpu.matmul %958, %959, %cst_25 {dimension_numbers = #tpu.dot_dimension_numbers<[1], [0], [0], [1], [0, 0, 1, 1], [], []>} : vector<8x128xbf16>, vector<128x256xbf16>, vector<8x256xf32> -> vector<8x256xf32>
    %961 = arith.addf %841, %960 : vector<8x256xf32>
    %cst_26 = arith.constant 6.250000e-02 : f32
    %962 = vector.broadcast %cst_26 : f32 to vector<8x256xf32>
    %963 = arith.mulf %961, %962 : vector<8x256xf32>
    %c0_27 = arith.constant 0 : index
    %c0_28 = arith.constant 0 : index
    %964 = vector.load %arg3[%c0_27, %c0_28] : memref<1x256xf32, #tpu.memory_space<vmem>>, vector<1x256xf32>
    %965 = vector.broadcast %964 : vector<1x256xf32> to vector<8x256xf32>
    %966 = arith.addf %963, %965 : vector<8x256xf32>
    %cst_29 = arith.constant 0.000000e+00 : f32
    %967 = vector.broadcast %cst_29 : f32 to vector<8x256xf32>
    %968 = arith.maximumf %966, %967 : vector<8x256xf32>
    %969 = arith.truncf %968 : vector<8x256xf32> to vector<8x256xbf16>
    %c0_30 = arith.constant 0 : index
    %c0_31 = arith.constant 0 : index
    %970 = vector.load %arg4[%c0_30, %c0_31] : memref<256x128xbf16, #tpu.memory_space<vmem>>, vector<256x128xbf16>
    %cst_32 = arith.constant dense<0.000000e+00> : vector<8x128xf32>
    %971 = tpu.matmul %969, %970, %cst_32 {dimension_numbers = #tpu.dot_dimension_numbers<[1], [0], [0], [1], [0, 0, 1, 1], [], []>} : vector<8x256xbf16>, vector<256x128xbf16>, vector<8x128xf32> -> vector<8x128xf32>
    %c0_33 = arith.constant 0 : index
    %c0_34 = arith.constant 0 : index
    %972 = vector.load %arg5[%c0_33, %c0_34] : memref<1x128xf32, #tpu.memory_space<vmem>>, vector<1x128xf32>
    %973 = vector.broadcast %972 : vector<1x128xf32> to vector<8x128xf32>
    %974 = arith.addf %971, %973 : vector<8x128xf32>
    %cst_35 = arith.constant 0.000000e+00 : f32
    %975 = vector.broadcast %cst_35 : f32 to vector<8x128xf32>
    %976 = arith.maximumf %974, %975 : vector<8x128xf32>
    %c0_36 = arith.constant 0 : index
    %c0_37 = arith.constant 0 : index
    %977 = vector.load %arg6[%c0_36, %c0_37] : memref<8x128xf32, #tpu.memory_space<vmem>>, vector<8x128xf32>
    tpu.vector_store %arg6[%c0_36, %c0_37], %976 {strides = array<i32>} : memref<8x128xf32, #tpu.memory_space<vmem>>, vector<8x128xf32>,
    return
  }
  func.func @transform_0(%arg0: i32) -> (i32, i32) {
    %c0_i32 = arith.constant 0 : i32
    %c0_i32_0 = arith.constant 0 : i32
    return %arg0, %c0_i32 : i32, i32
  }
  func.func @transform_1(%arg0: i32) -> (i32, i32) {
    %c0_i32 = arith.constant 0 : i32
    %c0_i32_0 = arith.constant 0 : i32
    %c0_i32_1 = arith.constant 0 : i32
    return %c0_i32, %c0_i32_0 : i32, i32
  }
  func.func @transform_2(%arg0: i32) -> (i32, i32) {
    %c0_i32 = arith.constant 0 : i32
    %c0_i32_0 = arith.constant 0 : i32
    %c0_i32_1 = arith.constant 0 : i32
    return %c0_i32, %c0_i32_0 : i32, i32
  }
  func.func @transform_3(%arg0: i32) -> (i32, i32) {
    %c0_i32 = arith.constant 0 : i32
    %c0_i32_0 = arith.constant 0 : i32
    %c0_i32_1 = arith.constant 0 : i32
    return %c0_i32, %c0_i32_0 : i32, i32
  }
  func.func @transform_4(%arg0: i32) -> (i32, i32) {
    %c0_i32 = arith.constant 0 : i32
    %c0_i32_0 = arith.constant 0 : i32
    %c0_i32_1 = arith.constant 0 : i32
    return %c0_i32, %c0_i32_0 : i32, i32
  }
  func.func @transform_5(%arg0: i32) -> (i32, i32) {
    %c0_i32 = arith.constant 0 : i32
    %c0_i32_0 = arith.constant 0 : i32
    return %arg0, %c0_i32 : i32, i32
  }
}

</mosaic_0001>

<bundles_post_ra>
// kernel: codet5_classification_forward.1
= control target key start
LH: loop header
LB: loop body
LE: loop exit
PB: predicated region body
PF: predicated region fallthrough
CT: control target
= control target key end

     0   :  { %10 = vsyncpa [#allocation3], 0  ;;  %s3308_s0 = inlined_call_operand.hbm [shape: s32[8,16], index: 0, kind: input, shape index: {}]   ;;  %s3309_s1 = inlined_call_operand.hbm [shape: bf16[1024,256], index: 1, kind: input, shape index: {}]   ;;  %s3310_s2 = inlined_call_operand.vmem [shape: f32[1,256], index: 2, kind: input, shape index: {}]   ;;  %s3311_s3 = inlined_call_operand.hbm [shape: bf16[256,128], index: 3, kind: input, shape index: {}]   ;;  %s3312_s4 = inlined_call_operand.vmem [shape: f32[1,128], index: 4, kind: input, shape index: {}]   ;;  %s3313_s5 = inlined_call_operand.hbm [shape: f32[8,128], index: 5, kind: output, shape index: {}]  }
   0x1   :  { %11 = vsyncpa [#allocation6], 0 }
   0x2   :  { %12 = vsyncpa [#allocation4], 0  ;;  %s2625_s18 = smov [#allocation5]   ;;  %s2531_s22 = scalar_lea.hbm %s3309_s1, 16384 }
   0x3   :  { %s28_s19 = sshll.u32 %s2625_s18, 4  ;;  %p2532_p0 = scmp.ne.s32.totalorder %s3309_s1, %s2531_s22  ;;  %s29_s19 = int_to_ptr.vmem [resolvable:$true] %s28_s19 }
   0x4   :  { %p2535_p1 = scmp.lt.u32.totalorder %s2531_s22, %s3309_s1 }
   0x6   :  { %p2537_p2 = pnand %p2535_p1, %p2532_p0 }
   0x8   :  { %2540 = shalt.err (!%p2537_p2)
}
   0x9   :  { %s2541_s27 = scalar_lea.vmem %s29_s19, 16384  ;;  %p2546_p4 = scmp.lt.s32.totalorder %s29_s19, %s29_s19 }
   0xa   :  { %p2542_p3 = scmp.ne.s32.totalorder %s29_s19, %s2541_s27  ;;  %p2547_p5 = scmp.lt.s32.totalorder %s2541_s27, %s2541_s27 }
   0xc   :  { %p2548_p6 = por %p2547_p5, %p2546_p4 }
   0xe   :  { %p2549_p7 = pnand %p2548_p6, %p2542_p3 }
  0x10   :  { %2552 = shalt.err (!%p2549_p7)
}
  0x11   :  { %s2626_s28 = smov 128   ;;  %s2627_s29 = smov 8  }
  0x12   :  { %34 = dma.hbm_to_vmem [thread:$0]  %s3309_s1, 16384, %s29_s19, [#allocation6], %s2626_s28, %s2626_s28, %s2627_s29  }
  0x13   :  { %s2628_s7 = smov [#allocation2]   ;;  %s2629_s9 = smov [#allocation7]  }
  0x14   :  { %s19_s8 = sshll.u32 %s2628_s7, 4  ;;  %s42_s10 = sshll.u32 %s2629_s9, 4  ;;  %s20_s8 = int_to_ptr.vmem [resolvable:$true] %s19_s8  ;;  %s43_s10 = int_to_ptr.vmem [resolvable:$true] %s42_s10 }
  0x15   :  { %s2553_s13 = scalar_lea.hbm %s3308_s0, 128 }
  0x16   :  { %p2554_p8 = scmp.ne.s32.totalorder %s3308_s0, %s2553_s13  ;;  %p2557_p9 = scmp.lt.u32.totalorder %s2553_s13, %s3308_s0 }
  0x18   :  { %p2559_p10 = pnand %p2557_p9, %p2554_p8 }
  0x1a   :  { %2562 = shalt.err (!%p2559_p10)
}
  0x1b   :  { %s2563_s1 = scalar_lea.vmem %s20_s8, 128  ;;  %p2568_p12 = scmp.lt.s32.totalorder %s20_s8, %s20_s8 }
  0x1c   :  { %p2564_p11 = scmp.ne.s32.totalorder %s20_s8, %s2563_s1  ;;  %p2569_p13 = scmp.lt.s32.totalorder %s2563_s1, %s2563_s1 }
  0x1e   :  { %p2570_p0 = por %p2569_p13, %p2568_p12 }
  0x20   :  { %p2571_p1 = pnand %p2570_p0, %p2564_p11 }
  0x22   :  { %2574 = shalt.err (!%p2571_p1)
}
  0x23   :  { %22 = dma.hbm_to_vmem [thread:$0]  %s3308_s0, 128, %s20_s8, [#allocation3]  }
  0x24   :  { %s2575_s22 = scalar_lea.hbm %s3311_s3, 2048 }
  0x25   :  { %p2576_p2 = scmp.ne.s32.totalorder %s3311_s3, %s2575_s22  ;;  %p2579_p3 = scmp.lt.u32.totalorder %s2575_s22, %s3311_s3 }
  0x27   :  { %p2581_p4 = pnand %p2579_p3, %p2576_p2 }
  0x29   :  { %2584 = shalt.err (!%p2581_p4)
}
  0x2a   :  { %s2585_s27 = scalar_lea.vmem %s43_s10, 2048  ;;  %p2590_p6 = scmp.lt.s32.totalorder %s43_s10, %s43_s10 }
  0x2b   :  { %p2586_p5 = scmp.ne.s32.totalorder %s43_s10, %s2585_s27  ;;  %p2591_p7 = scmp.lt.s32.totalorder %s2585_s27, %s2585_s27 }
  0x2d   :  { %p2592_p8 = por %p2591_p7, %p2590_p6 }
  0x2f   :  { %p2593_p9 = pnand %p2592_p8, %p2586_p5 }
  0x31   :  { %2596 = shalt.err (!%p2593_p9)
}
  0x32   :  { %s2630_s0 = smov 64   ;;  %s2631_s28 = smov 4  }
  0x33   :  { %48 = dma.hbm_to_vmem [thread:$0]  %s3311_s3, 2048, %s43_s10, [#allocation6], %s2630_s0, %s2630_s0, %s2631_s28  }
  0x34   :  { %2619 = dma.done.wait [#allocation3], 128  }
  0x35   :  { %2620 = vsyncadd [#allocation3], 4294967168 }
  0x36   :  { %2621 = dma.done.wait [#allocation6], 18432  }
  0x37   :  { %2622 = vsyncadd [#allocation6], 4294948864  ;;  %v2632_v0 = vmov 2   ;;  %v2633_v1 = vmov 0   ;;  %v61_v2 = vld [vmem:[#allocation2] sm:$0xff]  ;;  %v2634_v3 = vmov 3   ;;  %v62_v51 = vlaneseq }
  0x38   :  { %2308 = vset.pattern.permute.xlu1 %v2632_v0  ;;  %2306 = vset.pattern.permute.xlu0 %v2633_v1  ;;  %v2635_v4 = vmov 1   ;;  %v2636_v5 = vmov 4   ;;  %v2637_v6 = vmov 5   ;;  %v2638_v7 = vmov 6   ;;  %v2323_v17 = vld [vmem:[#allocation5 + $0x84] ss:$8 sps:$4 sm:$0xff]  }
  0x39   :  { %387 = vmatprep.mubr.bf16.mxu1 %v2633_v1  ;;  %916 = vmatprep.mubr.bf16.mxu0 %v2633_v1  ;;  %v2639_v8 = vmov 8   ;;  %v2640_v9 = vmov 7   ;;  %v2641_v10 = vmov 11   ;;  %v2642_v11 = vmov 9   ;;  %v2325_v18 = vld [vmem:[#allocation5 + $0x184] ss:$8 sps:$4 sm:$0xff]  }
  0x3a   :  { %79 = vperm.xlu1 %2308, %v61_v2   ;;  %65 = vperm.xlu0 %2306, %v61_v2   ;;  %v2643_v12 = vmov 14   ;;  %v2644_v13 = vmov 10   ;;  %v2645_v14 = vmov 15   ;;  %v2646_v15 = vmov 12   ;;  %v2327_v19 = vld [vmem:[#allocation5 + $0x80] ss:$8 sps:$4 sm:$0xff]  }
  0x3b   :  { %v2647_v16 = vmov 13   ;;  %v2328_v20 = vld [vmem:[#allocation5 + $0x180] ss:$8 sps:$4 sm:$0xff]   ;;  %355 = vmatprep.subr.bf16.mxu1 %v2323_v17  ;;  %884 = vmatprep.subr.bf16.mxu0 %v2325_v18  ;;  %v2329_v21 = vld [vmem:[#allocation5 + $0x94] ss:$8 sps:$4 sm:$0xff]   ;;  %v2720_v52 = vand.u32 127, %v62_v51 }
  0x3c   :  { %356 = vmatpush1.bf16.msra.mxu1 %v2327_v19  ;;  %885 = vmatpush1.bf16.msra.mxu0 %v2328_v20  ;;  %v2331_v22 = vld [vmem:[#allocation5 + $0x194] ss:$8 sps:$4 sm:$0xff]   ;;  %v2333_v23 = vld [vmem:[#allocation5 + $0x90] ss:$8 sps:$4 sm:$0xff]   ;;  %v2335_v25 = vld [vmem:[#allocation5 + $0xa4] ss:$8 sps:$4 sm:$0xff]  }
  0x3d   :  { %v2334_v24 = vld [vmem:[#allocation5 + $0x190] ss:$8 sps:$4 sm:$0xff]   ;;  %357 = vmatprep.subr.bf16.mxu1 %v2329_v21  ;;  %886 = vmatprep.subr.bf16.mxu0 %v2331_v22  ;;  %v2337_v26 = vld [vmem:[#allocation5 + $0x1a4] ss:$8 sps:$4 sm:$0xff]   ;;  %v2339_v27 = vld [vmem:[#allocation5 + $0xa0] ss:$8 sps:$4 sm:$0xff]  }
  0x3e   :  { %2309 = vset.pattern.permute.xlu1 %v2634_v3  ;;  %2307 = vset.pattern.permute.xlu0 %v2635_v4  ;;  %v2340_v28 = vld [vmem:[#allocation5 + $0x1a0] ss:$8 sps:$4 sm:$0xff]   ;;  %v2341_v29 = vld [vmem:[#allocation5 + $0xb4] ss:$8 sps:$4 sm:$0xff]   ;;  %v2345_v31 = vld [vmem:[#allocation5 + $0xb0] ss:$8 sps:$4 sm:$0xff]  }
  0x3f   :  { %86 = vperm.xlu1 %2309, %v61_v2   ;;  %72 = vperm.xlu0 %2307, %v61_v2   ;;  %v2343_v30 = vld [vmem:[#allocation5 + $0x1b4] ss:$8 sps:$4 sm:$0xff]   ;;  %v2346_v32 = vld [vmem:[#allocation5 + $0x1b0] ss:$8 sps:$4 sm:$0xff]   ;;  %v2347_v33 = vld [vmem:[#allocation5 + $0xc4] ss:$8 sps:$4 sm:$0xff]  }
  0x40   :  { %358 = vmatpush1.bf16.msra.mxu1 %v2333_v23  ;;  %887 = vmatpush1.bf16.msra.mxu0 %v2334_v24  ;;  %v2349_v34 = vld [vmem:[#allocation5 + $0x1c4] ss:$8 sps:$4 sm:$0xff]   ;;  %v2351_v35 = vld [vmem:[#allocation5 + $0xc0] ss:$8 sps:$4 sm:$0xff]   ;;  %v2353_v37 = vld [vmem:[#allocation5 + $0xd4] ss:$8 sps:$4 sm:$0xff]  }
  0x41   :  { %359 = vmatprep.subr.bf16.mxu1 %v2335_v25  ;;  %888 = vmatprep.subr.bf16.mxu0 %v2337_v26  ;;  %v2352_v36 = vld [vmem:[#allocation5 + $0x1c0] ss:$8 sps:$4 sm:$0xff]   ;;  %v2355_v38 = vld [vmem:[#allocation5 + $0x1d4] ss:$8 sps:$4 sm:$0xff]   ;;  %v2357_v39 = vld [vmem:[#allocation5 + $0xd0] ss:$8 sps:$4 sm:$0xff]  }
  0x42   :  { %v2358_v40 = vld [vmem:[#allocation5 + $0x1d0] ss:$8 sps:$4 sm:$0xff]   ;;  %v2359_v41 = vld [vmem:[#allocation5 + $0xe4] ss:$8 sps:$4 sm:$0xff]   ;;  %v2363_v43 = vld [vmem:[#allocation5 + $0xe0] ss:$8 sps:$4 sm:$0xff]  }
  0x43   :  { %2310 = vset.pattern.permute.xlu1 %v2636_v5  ;;  %2311 = vset.pattern.permute.xlu0 %v2637_v6  ;;  %v2361_v42 = vld [vmem:[#allocation5 + $0x1e4] ss:$8 sps:$4 sm:$0xff]   ;;  %v2364_v44 = vld [vmem:[#allocation5 + $0x1e0] ss:$8 sps:$4 sm:$0xff]   ;;  %v2365_v45 = vld [vmem:[#allocation5 + $0xf4] ss:$8 sps:$4 sm:$0xff]  }
  0x44   :  { %93 = vperm.xlu1 %2310, %v61_v2   ;;  %100 = vperm.xlu0 %2311, %v61_v2   ;;  %v2367_v46 = vld [vmem:[#allocation5 + $0x1f4] ss:$8 sps:$4 sm:$0xff]   ;;  %v2369_v47 = vld [vmem:[#allocation5 + $0xf0] ss:$8 sps:$4 sm:$0xff]   ;;  %v2373_v49 = vld [vmem:[#allocation5 + $0x4] ss:$8 sps:$4 sm:$0xff]  }
  0x45   :  { %360 = vmatpush1.bf16.msra.mxu1 %v2339_v27  ;;  %889 = vmatpush1.bf16.msra.mxu0 %v2340_v28  ;;  %v2370_v48 = vld [vmem:[#allocation5 + $0x1f0] ss:$8 sps:$4 sm:$0xff]   ;;  %v2376_v50 = vld [vmem:[#allocation5 + $0x204] ss:$8 sps:$4 sm:$0xff]   ;;  %v2723_v53 = vadd.s32 128, %v2720_v52  ;;  %v2726_v55 = vadd.s32 256, %v2720_v52 }
  0x46   :  { %361 = vmatprep.subr.bf16.mxu1 %v2341_v29  ;;  %890 = vmatprep.subr.bf16.mxu0 %v2343_v30  ;;  %v2729_v56 = vadd.s32 384, %v2720_v52  ;;  %v2732_v57 = vadd.s32 512, %v2720_v52  ;;  %v2735_v58 = vadd.s32 640, %v2720_v52  ;;  %v2738_v59 = vadd.s32 768, %v2720_v52  ;;  %s2649_s8 = smov [#allocation8]  }
  0x47   :  { %v2741_v60 = vadd.s32 896, %v2720_v52  ;;  %v2648_v62 = vmov 0.0   ;;  %s1950_s9 = sshll.u32 %s2649_s8, 4  ;;  %s1951_s9 = int_to_ptr.vmem [resolvable:$true] %s1950_s9 }
  0x48   :  { %2312 = vset.pattern.permute.xlu1 %v2638_v7  ;;  %2314 = vset.pattern.permute.xlu0 %v2639_v8  ;;  %s2597_s10 = scalar_lea.vmem %s1951_s9, 128  ;;  %p2602_p11 = scmp.lt.s32.totalorder %s1951_s9, %s1951_s9 }
  0x49   :  { %107 = vperm.xlu1 %2312, %v61_v2   ;;  %121 = vperm.xlu0 %2314, %v61_v2   ;;  %p2598_p10 = scmp.ne.s32.totalorder %s1951_s9, %s2597_s10  ;;  %p2603_p12 = scmp.lt.s32.totalorder %s2597_s10, %s2597_s10 }
  0x4a   :  { %362 = vmatpush1.bf16.msra.mxu1 %v2345_v31  ;;  %891 = vmatpush1.bf16.msra.mxu0 %v2346_v32 }
  0x4b   :  { %363 = vmatprep.subr.bf16.mxu1 %v2347_v33  ;;  %892 = vmatprep.subr.bf16.mxu0 %v2349_v34  ;;  %p2604_p13 = por %p2603_p12, %p2602_p11 }
  0x4d   :  { %2313 = vset.pattern.permute.xlu1 %v2640_v9  ;;  %2317 = vset.pattern.permute.xlu0 %v2641_v10  ;;  %p2605_p0 = pnand %p2604_p13, %p2598_p10 }
  0x4e   :  { %114 = vperm.xlu1 %2313, %v61_v2   ;;  %142 = vperm.xlu0 %2317, %v61_v2  }
  0x4f   :  { %364 = vmatpush1.bf16.msra.mxu1 %v2351_v35  ;;  %893 = vmatpush1.bf16.msra.mxu0 %v2352_v36 }
  0x50   :  { %365 = vmatprep.subr.bf16.mxu1 %v2353_v37  ;;  %894 = vmatprep.subr.bf16.mxu0 %v2355_v38 }
  0x52   :  { %2315 = vset.pattern.permute.xlu1 %v2642_v11  ;;  %2320 = vset.pattern.permute.xlu0 %v2643_v12 }
  0x53   :  { %128 = vperm.xlu1 %2315, %v61_v2   ;;  %163 = vperm.xlu0 %2320, %v61_v2  }
  0x54   :  { %366 = vmatpush1.bf16.msra.mxu1 %v2357_v39  ;;  %895 = vmatpush1.bf16.msra.mxu0 %v2358_v40 }
  0x55   :  { %367 = vmatprep.subr.bf16.mxu1 %v2359_v41  ;;  %896 = vmatprep.subr.bf16.mxu0 %v2361_v42 }
  0x57   :  { %2316 = vset.pattern.permute.xlu1 %v2644_v13  ;;  %2322 = vset.pattern.permute.xlu0 %v2645_v14 }
  0x58   :  { %135 = vperm.xlu1 %2316, %v61_v2   ;;  %368 = vmatpush1.bf16.msra.mxu1 %v2363_v43 }
  0x59   :  { %897 = vmatpush1.bf16.msra.mxu0 %v2364_v44  ;;  %369 = vmatprep.subr.bf16.mxu1 %v2365_v45 }
  0x5a   :  { %898 = vmatprep.subr.bf16.mxu0 %v2367_v46 }
  0x5c   :  { %2318 = vset.pattern.permute.xlu1 %v2646_v15  ;;  %370 = vmatpush1.bf16.msra.mxu1 %v2369_v47 }
  0x5d   :  { %149 = vperm.xlu1 %2318, %v61_v2   ;;  %899 = vmatpush1.bf16.msra.mxu0 %v2370_v48 }
  0x5e   :  { %476 = vmatprep.subr.bf16.mxu1 %v2373_v49  ;;  %1089 = vmatprep.subr.bf16.mxu0 %v2376_v50 }
  0x61   :  { %2319 = vset.pattern.permute.xlu1 %v2647_v16 }
  0x62   :  { %156 = vperm.xlu1 %2319, %v61_v2  }
  0x66   :  { %2321 = vset.pattern.permute.xlu1 %v2645_v14 }
  0x67   :  { %170 = vperm.xlu1 %2321, %v61_v2  }
  0xb9   :  { %v80_v54 = vpop.permute.xlu1 %79  ;;  %v66_v61 = vpop.permute.xlu0 %65 }
  0xba   :  { %vm81_vm0 = vcmp.eq.s32.totalorder %v80_v54, %v2720_v52  ;;  %vm202_vm1 = vcmp.eq.s32.totalorder %v80_v54, %v2723_v53  ;;  %vm526_vm2 = vcmp.eq.s32.totalorder %v80_v54, %v2726_v55  ;;  %vm731_vm3 = vcmp.eq.s32.totalorder %v80_v54, %v2729_v56 }
  0xbb   :  { %v2748_v63 = vsel %vm81_vm0, 1.0, %v2648_v62  ;;  %vm936_vm4 = vcmp.eq.s32.totalorder %v80_v54, %v2732_v57  ;;  %v2752_v0 = vsel %vm202_vm1, 1.0, %v2648_v62  ;;  %vm1141_vm5 = vcmp.eq.s32.totalorder %v80_v54, %v2735_v58 }
  0xbc   :  { %vm1346_vm6 = vcmp.eq.s32.totalorder %v80_v54, %v2738_v59  ;;  %vm1551_vm7 = vcmp.eq.s32.totalorder %v80_v54, %v2741_v60  ;;  %v2026_v2 = vsel %vm526_vm2, 1.0, %v2648_v62  ;;  %v2759_v3 = vsel %vm731_vm3, 1.0, %v2648_v62 }
  0xbd   :  { %vm67_vm8 = vcmp.eq.s32.totalorder %v66_v61, %v2720_v52  ;;  %vm518_vm9 = vcmp.eq.s32.totalorder %v66_v61, %v2726_v55  ;;  %v2764_v4 = vsel %vm936_vm4, 1.0, %v2648_v62  ;;  %vm194_vm10 = vcmp.eq.s32.totalorder %v66_v61, %v2723_v53 }
  0xbe   :  { %vm723_vm11 = vcmp.eq.s32.totalorder %v66_v61, %v2729_v56  ;;  %vm928_vm12 = vcmp.eq.s32.totalorder %v66_v61, %v2732_v57  ;;  %v73_v5 = vpop.permute.xlu0 %72  ;;  %v2122_v6 = vsel %vm1141_vm5, 1.0, %v2648_v62  ;;  %v2154_v7 = vsel %vm1346_vm6, 1.0, %v2648_v62  ;;  %v2773_v9 = vpop.permute.xlu1 %86 }
  0xbf   :  { %v2186_v8 = vsel %vm1551_vm7, 1.0, %v2648_v62  ;;  %vm1133_vm13 = vcmp.eq.s32.totalorder %v66_v61, %v2735_v58  ;;  %v1960_v10 = vsel %vm67_vm8, 1.0, %v2648_v62  ;;  %v2024_v11 = vsel %vm518_vm9, 1.0, %v2648_v62 }
  0xc0   :  { %vm1338_vm14 = vcmp.eq.s32.totalorder %v66_v61, %v2738_v59  ;;  %vm1543_vm15 = vcmp.eq.s32.totalorder %v66_v61, %v2741_v60  ;;  %v1976_v12 = vsel %vm194_vm10, 1.0, %v2648_v62  ;;  %v2056_v13 = vsel %vm723_vm11, 1.0, %v2648_v62 }
  0xc1   :  { %v2088_v14 = vsel %vm928_vm12, 1.0, %v2648_v62  ;;  %vm522_vm0 = vcmp.eq.s32.totalorder %v73_v5, %v2726_v55  ;;  %v2120_v15 = vsel %vm1133_vm13, 1.0, %v2648_v62  ;;  %vm530_vm1 = vcmp.eq.s32.totalorder %v2773_v9, %v2726_v55 }
  0xc2   :  { %vm74_vm2 = vcmp.eq.s32.totalorder %v73_v5, %v2720_v52  ;;  %v2025_v16 = vsel %vm522_vm0, 1.0, %v2648_v62  ;;  %v2152_v17 = vsel %vm1338_vm14, 1.0, %v2648_v62  ;;  %v2184_v18 = vsel %vm1543_vm15, 1.0, %v2648_v62 }
  0xc3   :  { %vm198_vm3 = vcmp.eq.s32.totalorder %v73_v5, %v2723_v53  ;;  %v525_v19 = vadd.f32 %v2025_v16, %v2024_v11  ;;  %vm88_vm4 = vcmp.eq.s32.totalorder %v2773_v9, %v2720_v52  ;;  %vm1137_vm5 = vcmp.eq.s32.totalorder %v73_v5, %v2735_v58  ;;  %v2809_v30 = vpop.permute.xlu1 %93 }
  0xc4   :  { %vm1342_vm6 = vcmp.eq.s32.totalorder %v73_v5, %v2738_v59  ;;  %vm1547_vm7 = vcmp.eq.s32.totalorder %v73_v5, %v2741_v60  ;;  %vm206_vm8 = vcmp.eq.s32.totalorder %v2773_v9, %v2723_v53  ;;  %v2027_v20 = vsel %vm530_vm1, 1.0, %v2648_v62 }
  0xc5   :  { %vm1145_vm9 = vcmp.eq.s32.totalorder %v2773_v9, %v2735_v58  ;;  %v1961_v21 = vsel %vm74_vm2, 1.0, %v2648_v62  ;;  %v529_v22 = vadd.f32 %v2026_v2, %v525_v19  ;;  %v1977_v23 = vsel %vm198_vm3, 1.0, %v2648_v62 }
  0xc6   :  { %v2121_v24 = vsel %vm1137_vm5, 1.0, %v2648_v62  ;;  %v2153_v25 = vsel %vm1342_vm6, 1.0, %v2648_v62  ;;  %v2185_v26 = vsel %vm1547_vm7, 1.0, %v2648_v62  ;;  %vm735_vm10 = vcmp.eq.s32.totalorder %v2773_v9, %v2729_v56 }
  0xc7   :  { %vm727_vm11 = vcmp.eq.s32.totalorder %v73_v5, %v2729_v56  ;;  %v1140_v27 = vadd.f32 %v2121_v24, %v2120_v15  ;;  %v1345_v28 = vadd.f32 %v2153_v25, %v2152_v17  ;;  %v1550_v29 = vadd.f32 %v2185_v26, %v2184_v18 }
  0xc8   :  { %vm1350_vm12 = vcmp.eq.s32.totalorder %v2773_v9, %v2738_v59  ;;  %vm1555_vm13 = vcmp.eq.s32.totalorder %v2773_v9, %v2741_v60  ;;  %v77_v31 = vadd.f32 %v1961_v21, %v1960_v10  ;;  %vm932_vm14 = vcmp.eq.s32.totalorder %v73_v5, %v2732_v57  ;;  %v2852_v2 = vpop.permute.xlu1 %107 }
  0xc9   :  { %v201_v32 = vadd.f32 %v1977_v23, %v1976_v12  ;;  %v1144_v33 = vadd.f32 %v2122_v6, %v1140_v27  ;;  %v1349_v34 = vadd.f32 %v2154_v7, %v1345_v28  ;;  %v1554_v35 = vadd.f32 %v2186_v8, %v1550_v29 }
  0xca   :  { %v1963_v36 = vsel %vm88_vm4, 1.0, %v2648_v62  ;;  %v2057_v37 = vsel %vm727_vm11, 1.0, %v2648_v62  ;;  %v533_v38 = vadd.f32 %v2027_v20, %v529_v22  ;;  %vm534_vm15 = vcmp.eq.s32.totalorder %v2809_v30, %v2726_v55 }
  0xcb   :  { %vm940_vm0 = vcmp.eq.s32.totalorder %v2773_v9, %v2732_v57  ;;  %v2123_v39 = vsel %vm1145_vm9, 1.0, %v2648_v62  ;;  %v2089_v40 = vsel %vm932_vm14, 1.0, %v2648_v62  ;;  %v2028_v41 = vsel %vm534_vm15, 1.0, %v2648_v62 }
  0xcc   :  { %v2155_v42 = vsel %vm1350_vm12, 1.0, %v2648_v62  ;;  %v2187_v43 = vsel %vm1555_vm13, 1.0, %v2648_v62  ;;  %v84_v44 = vadd.f32 %v2748_v63, %v77_v31  ;;  %v537_v45 = vadd.f32 %v2028_v41, %v533_v38 }
  0xcd   :  { %v205_v46 = vadd.f32 %v2752_v0, %v201_v32  ;;  %v730_v47 = vadd.f32 %v2057_v37, %v2056_v13  ;;  %v1148_v48 = vadd.f32 %v2123_v39, %v1144_v33  ;;  %vm1149_vm1 = vcmp.eq.s32.totalorder %v2809_v30, %v2735_v58  ;;  %v2850_v0 = vpop.permute.xlu0 %100 }
  0xce   :  { %v935_v49 = vadd.f32 %v2089_v40, %v2088_v14  ;;  %vm95_vm2 = vcmp.eq.s32.totalorder %v2809_v30, %v2720_v52  ;;  %v2124_v50 = vsel %vm1149_vm1, 1.0, %v2648_v62  ;;  %v1353_v54 = vadd.f32 %v2155_v42, %v1349_v34 }
  0xcf   :  { %v1152_v61 = vadd.f32 %v2124_v50, %v1148_v48  ;;  %vm1354_vm3 = vcmp.eq.s32.totalorder %v2809_v30, %v2738_v59  ;;  %v1558_v63 = vadd.f32 %v2187_v43, %v1554_v35  ;;  %vm1559_vm4 = vcmp.eq.s32.totalorder %v2809_v30, %v2741_v60 }
  0xd0   :  { %v1979_v5 = vsel %vm206_vm8, 1.0, %v2648_v62  ;;  %v91_v6 = vadd.f32 %v1963_v36, %v84_v44  ;;  %v2156_v7 = vsel %vm1354_vm3, 1.0, %v2648_v62  ;;  %v2188_v8 = vsel %vm1559_vm4, 1.0, %v2648_v62 }
  0xd1   :  { %v1964_v10 = vsel %vm95_vm2, 1.0, %v2648_v62  ;;  %vm210_vm5 = vcmp.eq.s32.totalorder %v2809_v30, %v2723_v53  ;;  %v1357_v11 = vadd.f32 %v2156_v7, %v1353_v54  ;;  %v1562_v12 = vadd.f32 %v2188_v8, %v1558_v63 }
  0xd2   :  { %v2059_v13 = vsel %vm735_vm10, 1.0, %v2648_v62  ;;  %v2091_v14 = vsel %vm940_vm0, 1.0, %v2648_v62  ;;  %v734_v15 = vadd.f32 %v2759_v3, %v730_v47  ;;  %vm538_vm6 = vcmp.eq.s32.totalorder %v2850_v0, %v2726_v55 }
  0xd3   :  { %v939_v16 = vadd.f32 %v2764_v4, %v935_v49  ;;  %v209_v17 = vadd.f32 %v1979_v5, %v205_v46  ;;  %v2029_v18 = vsel %vm538_vm6, 1.0, %v2648_v62  ;;  %vm1153_vm7 = vcmp.eq.s32.totalorder %v2850_v0, %v2735_v58  ;;  %v2886_v4 = vpop.permute.xlu1 %114 }
  0xd4   :  { %v98_v19 = vadd.f32 %v1964_v10, %v91_v6  ;;  %v1980_v20 = vsel %vm210_vm5, 1.0, %v2648_v62  ;;  %v541_v21 = vadd.f32 %v2029_v18, %v537_v45  ;;  %v2125_v9 = vsel %vm1153_vm7, 1.0, %v2648_v62 }
  0xd5   :  { %vm739_vm8 = vcmp.eq.s32.totalorder %v2809_v30, %v2729_v56  ;;  %v1156_v3 = vadd.f32 %v2125_v9, %v1152_v61  ;;  %vm1358_vm9 = vcmp.eq.s32.totalorder %v2850_v0, %v2738_v59  ;;  %vm1563_vm10 = vcmp.eq.s32.totalorder %v2850_v0, %v2741_v60  ;;  %v2938_v61 = vpop.permute.xlu0 %121 }
  0xd6   :  { %vm944_vm11 = vcmp.eq.s32.totalorder %v2809_v30, %v2732_v57  ;;  %vm102_vm12 = vcmp.eq.s32.totalorder %v2850_v0, %v2720_v52  ;;  %v2157_v22 = vsel %vm1358_vm9, 1.0, %v2648_v62  ;;  %v2189_v23 = vsel %vm1563_vm10, 1.0, %v2648_v62 }
  0xd7   :  { %v213_v24 = vadd.f32 %v1980_v20, %v209_v17  ;;  %vm214_vm13 = vcmp.eq.s32.totalorder %v2850_v0, %v2723_v53  ;;  %v1361_v25 = vadd.f32 %v2157_v22, %v1357_v11  ;;  %v1566_v26 = vadd.f32 %v2189_v23, %v1562_v12  ;;  %v2914_v37 = vpop.permute.xlu1 %128 }
  0xd8   :  { %v738_v27 = vadd.f32 %v2059_v13, %v734_v15  ;;  %v2060_v28 = vsel %vm739_vm8, 1.0, %v2648_v62  ;;  %v943_v29 = vadd.f32 %v2091_v14, %v939_v16  ;;  %vm542_vm14 = vcmp.eq.s32.totalorder %v2852_v2, %v2726_v55 }
  0xd9   :  { %v2092_v30 = vsel %vm944_vm11, 1.0, %v2648_v62  ;;  %v1965_v31 = vsel %vm102_vm12, 1.0, %v2648_v62  ;;  %v2030_v32 = vsel %vm542_vm14, 1.0, %v2648_v62  ;;  %vm1157_vm15 = vcmp.eq.s32.totalorder %v2852_v2, %v2735_v58 }
  0xda   :  { %v1981_v33 = vsel %vm214_vm13, 1.0, %v2648_v62  ;;  %vm743_vm0 = vcmp.eq.s32.totalorder %v2850_v0, %v2729_v56  ;;  %v545_v34 = vadd.f32 %v2030_v32, %v541_v21  ;;  %v2126_v35 = vsel %vm1157_vm15, 1.0, %v2648_v62 }
  0xdb   :  { %vm948_vm1 = vcmp.eq.s32.totalorder %v2850_v0, %v2732_v57  ;;  %v1160_v36 = vadd.f32 %v2126_v35, %v1156_v3  ;;  %vm1362_vm2 = vcmp.eq.s32.totalorder %v2852_v2, %v2738_v59  ;;  %vm1567_vm3 = vcmp.eq.s32.totalorder %v2852_v2, %v2741_v60  ;;  %v2943_v6 = vpop.permute.xlu1 %135 }
  0xdc   :  { %v742_v38 = vadd.f32 %v2060_v28, %v738_v27  ;;  %vm109_vm4 = vcmp.eq.s32.totalorder %v2852_v2, %v2720_v52  ;;  %v2158_v39 = vsel %vm1362_vm2, 1.0, %v2648_v62  ;;  %v2190_v40 = vsel %vm1567_vm3, 1.0, %v2648_v62 }
  0xdd   :  { %v947_v41 = vadd.f32 %v2092_v30, %v943_v29  ;;  %v105_v42 = vadd.f32 %v1965_v31, %v98_v19  ;;  %v1365_v43 = vadd.f32 %v2158_v39, %v1361_v25  ;;  %v1570_v44 = vadd.f32 %v2190_v40, %v1566_v26  ;;  %v2996_v29 = vpop.permute.xlu0 %142 }
  0xde   :  { %v217_v45 = vadd.f32 %v1981_v33, %v213_v24  ;;  %v2061_v46 = vsel %vm743_vm0, 1.0, %v2648_v62  ;;  %v2093_v47 = vsel %vm948_vm1, 1.0, %v2648_v62  ;;  %vm546_vm5 = vcmp.eq.s32.totalorder %v2886_v4, %v2726_v55 }
  0xdf   :  { %v1966_v48 = vsel %vm109_vm4, 1.0, %v2648_v62  ;;  %vm218_vm6 = vcmp.eq.s32.totalorder %v2852_v2, %v2723_v53  ;;  %v2031_v49 = vsel %vm546_vm5, 1.0, %v2648_v62  ;;  %vm1161_vm7 = vcmp.eq.s32.totalorder %v2886_v4, %v2735_v58  ;;  %v2979_v22 = vpop.permute.xlu1 %149 }
  0xe0   :  { %vm952_vm8 = vcmp.eq.s32.totalorder %v2852_v2, %v2732_v57  ;;  %v549_v50 = vadd.f32 %v2031_v49, %v545_v34  ;;  %v2127_v54 = vsel %vm1161_vm7, 1.0, %v2648_v62  ;;  %vm1366_vm9 = vcmp.eq.s32.totalorder %v2886_v4, %v2738_v59 }
  0xe1   :  { %v951_v63 = vadd.f32 %v2093_v47, %v947_v41  ;;  %v1164_v0 = vadd.f32 %v2127_v54, %v1160_v36  ;;  %v2159_v5 = vsel %vm1366_vm9, 1.0, %v2648_v62  ;;  %vm1571_vm10 = vcmp.eq.s32.totalorder %v2886_v4, %v2741_v60 }
  0xe2   :  { %v112_v7 = vadd.f32 %v1966_v48, %v105_v42  ;;  %v1982_v8 = vsel %vm218_vm6, 1.0, %v2648_v62  ;;  %v1369_v10 = vadd.f32 %v2159_v5, %v1365_v43  ;;  %v2191_v11 = vsel %vm1571_vm10, 1.0, %v2648_v62 }
  0xe3   :  { %v2094_v12 = vsel %vm952_vm8, 1.0, %v2648_v62  ;;  %vm116_vm11 = vcmp.eq.s32.totalorder %v2886_v4, %v2720_v52  ;;  %v1574_v13 = vadd.f32 %v2191_v11, %v1570_v44  ;;  %vm550_vm12 = vcmp.eq.s32.totalorder %v2938_v61, %v2726_v55  ;;  %v3008_v35 = vpop.permute.xlu1 %156 }
  0xe4   :  { %vm956_vm13 = vcmp.eq.s32.totalorder %v2886_v4, %v2732_v57  ;;  %v2032_v14 = vsel %vm550_vm12, 1.0, %v2648_v62  ;;  %vm1165_vm14 = vcmp.eq.s32.totalorder %v2938_v61, %v2735_v58  ;;  %vm1370_vm15 = vcmp.eq.s32.totalorder %v2938_v61, %v2738_v59 }
  0xe5   :  { %vm747_vm0 = vcmp.eq.s32.totalorder %v2852_v2, %v2729_v56  ;;  %v2961_v15 = vadd.f32 %v2032_v14, %v549_v50  ;;  %v2128_v16 = vsel %vm1165_vm14, 1.0, %v2648_v62  ;;  %v2160_v17 = vsel %vm1370_vm15, 1.0, %v2648_v62 }
  0xe6   :  { %vm222_vm1 = vcmp.eq.s32.totalorder %v2886_v4, %v2723_v53  ;;  %v2967_v18 = vadd.f32 %v2128_v16, %v1164_v0  ;;  %v2969_v19 = vadd.f32 %v2160_v17, %v1369_v10  ;;  %vm1575_vm2 = vcmp.eq.s32.totalorder %v2938_v61, %v2741_v60 }
  0xe7   :  { %v955_v20 = vadd.f32 %v2094_v12, %v951_v63  ;;  %v1967_v21 = vsel %vm116_vm11, 1.0, %v2648_v62  ;;  %v2095_v9 = vsel %vm956_vm13, 1.0, %v2648_v62  ;;  %v2192_v3 = vsel %vm1575_vm2, 1.0, %v2648_v62 }
  0xe8   :  { %vm751_vm3 = vcmp.eq.s32.totalorder %v2886_v4, %v2729_v56  ;;  %vm123_vm4 = vcmp.eq.s32.totalorder %v2938_v61, %v2720_v52  ;;  %vm960_vm5 = vcmp.eq.s32.totalorder %v2938_v61, %v2732_v57  ;;  %v2987_v23 = vadd.f32 %v2192_v3, %v1574_v13 }
  0xe9   :  { %v746_v24 = vadd.f32 %v2061_v46, %v742_v38  ;;  %v1983_v25 = vsel %vm222_vm1, 1.0, %v2648_v62  ;;  %vm226_vm6 = vcmp.eq.s32.totalorder %v2938_v61, %v2723_v53  ;;  %v221_v26 = vadd.f32 %v1982_v8, %v217_v45  ;;  %v3026_v46 = vpop.permute.xlu0 %163 }
  0xea   :  { %v2062_v4 = vsel %vm747_vm0, 1.0, %v2648_v62  ;;  %v119_v27 = vadd.f32 %v1967_v21, %v112_v7  ;;  %v959_v28 = vadd.f32 %v2095_v9, %v955_v20  ;;  %v2063_v30 = vsel %vm751_vm3, 1.0, %v2648_v62 }
  0xeb   :  { %v1968_v31 = vsel %vm123_vm4, 1.0, %v2648_v62  ;;  %v2096_v32 = vsel %vm960_vm5, 1.0, %v2648_v62  ;;  %v225_v33 = vadd.f32 %v1983_v25, %v221_v26  ;;  %v1984_v34 = vsel %vm226_vm6, 1.0, %v2648_v62 }
  0xec   :  { %vm230_vm7 = vcmp.eq.s32.totalorder %v2914_v37, %v2723_v53  ;;  %vm234_vm8 = vcmp.eq.s32.totalorder %v2943_v6, %v2723_v53  ;;  %v750_v2 = vadd.f32 %v2062_v4, %v746_v24  ;;  %vm755_vm9 = vcmp.eq.s32.totalorder %v2938_v61, %v2729_v56  ;;  %v3042_v61 = vpop.permute.xlu1 %170 }
  0xed   :  { %v1985_v36 = vsel %vm230_vm7, 1.0, %v2648_v62  ;;  %vm238_vm10 = vcmp.eq.s32.totalorder %v2996_v29, %v2723_v53  ;;  %v126_v38 = vadd.f32 %v1968_v31, %v119_v27  ;;  %v3013_v39 = vadd.f32 %v2096_v32, %v959_v28 }
  0xee   :  { %vm130_vm11 = vcmp.eq.s32.totalorder %v2914_v37, %v2720_v52  ;;  %v229_v40 = vadd.f32 %v1984_v34, %v225_v33  ;;  %vm554_vm12 = vcmp.eq.s32.totalorder %v2914_v37, %v2726_v55  ;;  %vm964_vm13 = vcmp.eq.s32.totalorder %v2914_v37, %v2732_v57  ;;  %v2371_v33 = vld [vmem:[#allocation5] ss:$8 sps:$4 sm:$0xff]  }
  0xef   :  { %v1986_v41 = vsel %vm234_vm8, 1.0, %v2648_v62  ;;  %v754_v42 = vadd.f32 %v2063_v30, %v750_v2  ;;  %v1987_v44 = vsel %vm238_vm10, 1.0, %v2648_v62  ;;  %vm242_vm14 = vcmp.eq.s32.totalorder %v2979_v22, %v2723_v53 }
  0xf0   :  { %v233_v43 = vadd.f32 %v1985_v36, %v229_v40  ;;  %v2064_v45 = vsel %vm755_vm9, 1.0, %v2648_v62  ;;  %vm759_vm15 = vcmp.eq.s32.totalorder %v2914_v37, %v2729_v56  ;;  %vm763_vm0 = vcmp.eq.s32.totalorder %v2943_v6, %v2729_v56  ;;  %v2379_v36 = vld [vmem:[#allocation5 + $0x14] ss:$8 sps:$4 sm:$0xff]  }
  0xf1   :  { %v758_v47 = vadd.f32 %v2064_v45, %v754_v42  ;;  %vm767_vm1 = vcmp.eq.s32.totalorder %v2996_v29, %v2729_v56  ;;  %vm246_vm2 = vcmp.eq.s32.totalorder %v3008_v35, %v2723_v53  ;;  %v2065_v49 = vsel %vm759_vm15, 1.0, %v2648_v62 }
  0xf2   :  { %v237_v48 = vadd.f32 %v1986_v41, %v233_v43  ;;  %v2066_v50 = vsel %vm763_vm0, 1.0, %v2648_v62  ;;  %v1969_v54 = vsel %vm130_vm11, 1.0, %v2648_v62  ;;  %v1988_v63 = vsel %vm242_vm14, 1.0, %v2648_v62  ;;  %v2374_v43 = vld [vmem:[#allocation5 + $0x200] ss:$8 sps:$4 sm:$0xff]  }
  0xf3   :  { %v762_v0 = vadd.f32 %v2065_v49, %v758_v47  ;;  %vm771_vm3 = vcmp.eq.s32.totalorder %v2979_v22, %v2729_v56  ;;  %vm137_vm4 = vcmp.eq.s32.totalorder %v2943_v6, %v2720_v52  ;;  %vm250_vm5 = vcmp.eq.s32.totalorder %v3026_v46, %v2723_v53  ;;  %v2382_v49 = vld [vmem:[#allocation5 + $0x214] ss:$8 sps:$4 sm:$0xff]  }
  0xf4   :  { %v241_v5 = vadd.f32 %v1987_v44, %v237_v48  ;;  %v2067_v7 = vsel %vm767_vm1, 1.0, %v2648_v62  ;;  %v2033_v8 = vsel %vm554_vm12, 1.0, %v2648_v62  ;;  %v1989_v10 = vsel %vm246_vm2, 1.0, %v2648_v62  ;;  %v2377_v48 = vld [vmem:[#allocation5 + $0x10] ss:$8 sps:$4 sm:$0xff]  }
  0xf5   :  { %v766_v11 = vadd.f32 %v2066_v50, %v762_v0  ;;  %vm775_vm6 = vcmp.eq.s32.totalorder %v3008_v35, %v2729_v56  ;;  %vm1169_vm7 = vcmp.eq.s32.totalorder %v2914_v37, %v2735_v58  ;;  %vm254_vm8 = vcmp.eq.s32.totalorder %v3042_v61, %v2723_v53 }
  0xf6   :  { %v245_v12 = vadd.f32 %v1988_v63, %v241_v5  ;;  %v2068_v13 = vsel %vm771_vm3, 1.0, %v2648_v62  ;;  %v1990_v14 = vsel %vm250_vm5, 1.0, %v2648_v62  ;;  %vm779_vm9 = vcmp.eq.s32.totalorder %v3026_v46, %v2729_v56  ;;  %v2385_v63 = vld [vmem:[#allocation5 + $0x24] ss:$8 sps:$4 sm:$0xff]  }
  0xf7   :  { %v770_v16 = vadd.f32 %v2067_v7, %v766_v11  ;;  %v1970_v17 = vsel %vm137_vm4, 1.0, %v2648_v62  ;;  %v2069_v21 = vsel %vm775_vm6, 1.0, %v2648_v62  ;;  %v133_v9 = vadd.f32 %v1969_v54, %v126_v38 }
  0xf8   :  { %v249_v20 = vadd.f32 %v1989_v10, %v245_v12  ;;  %vm144_vm10 = vcmp.eq.s32.totalorder %v2996_v29, %v2720_v52  ;;  %vm1374_vm11 = vcmp.eq.s32.totalorder %v2914_v37, %v2738_v59  ;;  %v1991_v53 = vsel %vm254_vm8, 1.0, %v2648_v62 }
  0xf9   :  { %v774_v3 = vadd.f32 %v2068_v13, %v770_v16  ;;  %vm783_vm12 = vcmp.eq.s32.totalorder %v3042_v61, %v2729_v56  ;;  %v2097_v24 = vsel %vm964_vm13, 1.0, %v2648_v62  ;;  %v2070_v26 = vsel %vm779_vm9, 1.0, %v2648_v62  ;;  %v2388_v16 = vld [vmem:[#allocation5 + $0x224] ss:$8 sps:$4 sm:$0xff]  }
  0xfa   :  { %v253_v25 = vadd.f32 %v1990_v14, %v249_v20  ;;  %v140_v4 = vadd.f32 %v1970_v17, %v133_v9  ;;  %v2129_v27 = vsel %vm1169_vm7, 1.0, %v2648_v62  ;;  %vm1579_vm14 = vcmp.eq.s32.totalorder %v2914_v37, %v2741_v60  ;;  %v2383_v14 = vld [vmem:[#allocation5 + $0x20] ss:$8 sps:$4 sm:$0xff]  }
  0xfb   :  { %v778_v28 = vadd.f32 %v2069_v21, %v774_v3  ;;  %v1971_v56 = vsel %vm144_vm10, 1.0, %v2648_v62  ;;  %v3089_v30 = vsel %vm1374_vm11, 1.0, %v2648_v62  ;;  %v2071_v32 = vsel %vm783_vm12, 1.0, %v2648_v62  ;;  %v2391_v21 = vld [vmem:[#allocation5 + $0x34] ss:$8 sps:$4 sm:$0xff]  }
  0xfc   :  { %v257_v31 = vadd.f32 %v1991_v53, %v253_v25  ;;  %vm151_vm13 = vcmp.eq.s32.totalorder %v2979_v22, %v2720_v52  ;;  %vm558_vm15 = vcmp.eq.s32.totalorder %v2943_v6, %v2726_v55  ;;  %vm968_vm0 = vcmp.eq.s32.totalorder %v2943_v6, %v2732_v57 }
  0xfd   :  { %v782_v37 = vadd.f32 %v2070_v26, %v778_v28  ;;  %vm158_vm1 = vcmp.eq.s32.totalorder %v3008_v35, %v2720_v52  ;;  %v3101_v34 = vsel %vm1579_vm14, 1.0, %v2648_v62  ;;  %vm1173_vm2 = vcmp.eq.s32.totalorder %v2943_v6, %v2735_v58  ;;  %v2386_v26 = vld [vmem:[#allocation5 + $0x220] ss:$8 sps:$4 sm:$0xff]   ;;  %v2389_v28 = vld [vmem:[#allocation5 + $0x30] ss:$8 sps:$4 sm:$0xff]  }
  0xfe   :  { %v258_v2 = vpack.c.bf16 %v257_v31, %v257_v31  ;;  %v147_v38 = vadd.f32 %v1971_v56, %v140_v4  ;;  %vm1378_vm3 = vcmp.eq.s32.totalorder %v2943_v6, %v2738_v59  ;;  %v1972_v41 = vsel %vm151_vm13, 1.0, %v2648_v62  ;;  %v2394_v56 = vld [vmem:[#allocation5 + $0x234] ss:$8 sps:$4 sm:$0xff]  }
  0xff   :  { %v786_v40 = vadd.f32 %v2071_v32, %v782_v37  ;;  %v557_v42 = vadd.f32 %v2033_v8, %v2961_v15  ;;  %v3110_v44 = vsel %vm158_vm1, 1.0, %v2648_v62  ;;  %v2098_v45 = vsel %vm968_vm0, 1.0, %v2648_v62  ;;  %v2397_v37 = vld [vmem:[#allocation5 + $0x44] ss:$8 sps:$4 sm:$0xff]  }
 0x100   :  { %388 = vmatmul.mubr.bf16.vlgmr.msra.gmra.mrb[0].mxu1 %v258_v2  ;;  %v2034_v47 = vsel %vm558_vm15, 1.0, %v2648_v62  ;;  %vm562_vm4 = vcmp.eq.s32.totalorder %v2996_v29, %v2726_v55  ;;  %vm972_vm5 = vcmp.eq.s32.totalorder %v2996_v29, %v2732_v57  ;;  %v3126_v0 = vadd.f32 %v1972_v41, %v147_v38 }
 0x101   :  { %477 = vmatpush1.bf16.msra.mxu1 %v2371_v33  ;;  %v787_v15 = vpack.c.bf16 %v786_v40, %v786_v40  ;;  %508 = vmatprep.mubr.bf16.mxu1 %v2633_v1  ;;  %v561_v50 = vadd.f32 %v2034_v47, %v557_v42  ;;  %v2035_v54 = vsel %vm562_vm4, 1.0, %v2648_v62  ;;  %v967_v5 = vadd.f32 %v2097_v24, %v3013_v39  ;;  %v2380_v39 = vld [vmem:[#allocation5 + $0x210] ss:$8 sps:$4 sm:$0xff]  }
 0x102   :  { %478 = vmatprep.subr.bf16.mxu1 %v2379_v36  ;;  %vm566_vm6 = vcmp.eq.s32.totalorder %v2979_v22, %v2726_v55  ;;  %vm570_vm7 = vcmp.eq.s32.totalorder %v3008_v35, %v2726_v55  ;;  %vm1583_vm8 = vcmp.eq.s32.totalorder %v2943_v6, %v2741_v60  ;;  %vm976_vm9 = vcmp.eq.s32.totalorder %v2979_v22, %v2732_v57  ;;  %v2392_v40 = vld [vmem:[#allocation5 + $0x230] ss:$8 sps:$4 sm:$0xff]  }
 0x103   :  { %917 = vmatmul.mubr.bf16.vlgmr.msra.gmra.mrb[0].mxu0 %v787_v15  ;;  %v565_v7 = vadd.f32 %v2035_v54, %v561_v50  ;;  %v2036_v8 = vsel %vm566_vm6, 1.0, %v2648_v62  ;;  %vm574_vm10 = vcmp.eq.s32.totalorder %v3026_v46, %v2726_v55  ;;  %v971_v10 = vadd.f32 %v2098_v45, %v967_v5  ;;  %v2400_v45 = vld [vmem:[#allocation5 + $0x244] ss:$8 sps:$4 sm:$0xff]  }
 0x104   :  { %1090 = vmatpush1.bf16.msra.mxu0 %v2374_v43  ;;  %1121 = vmatprep.mubr.bf16.mxu0 %v2633_v1  ;;  %v2099_v11 = vsel %vm972_vm5, 1.0, %v2648_v62  ;;  %v2037_v12 = vsel %vm570_vm7, 1.0, %v2648_v62  ;;  %v1172_v13 = vadd.f32 %v2129_v27, %v2967_v18  ;;  %vm578_vm11 = vcmp.eq.s32.totalorder %v3042_v61, %v2726_v55  ;;  %v2395_v43 = vld [vmem:[#allocation5 + $0x40] ss:$8 sps:$4 sm:$0xff]  }
 0x105   :  { %1091 = vmatprep.subr.bf16.mxu0 %v2382_v49  ;;  %479 = vmatpush1.bf16.msra.mxu1 %v2377_v48  ;;  %v569_v17 = vadd.f32 %v2036_v8, %v565_v7  ;;  %v2130_v20 = vsel %vm1173_vm2, 1.0, %v2648_v62  ;;  %vm1177_vm12 = vcmp.eq.s32.totalorder %v2996_v29, %v2735_v58  ;;  %vm165_vm14 = vcmp.eq.s32.totalorder %v3026_v46, %v2720_v52  ;;  %v2403_v49 = vld [vmem:[#allocation5 + $0x54] ss:$8 sps:$4 sm:$0xff]   ;;  %v2398_v8 = vld [vmem:[#allocation5 + $0x240] ss:$8 sps:$4 sm:$0xff]  }
 0x106   :  { %480 = vmatprep.subr.bf16.mxu1 %v2385_v63  ;;  %v2038_v18 = vsel %vm574_vm10, 1.0, %v2648_v62  ;;  %v1176_v9 = vadd.f32 %v2130_v20, %v1172_v13  ;;  %v2131_v53 = vsel %vm1177_vm12, 1.0, %v2648_v62  ;;  %vm1181_vm13 = vcmp.eq.s32.totalorder %v2979_v22, %v2735_v58  ;;  %v2409_v13 = vld [vmem:[#allocation5 + $0x64] ss:$8 sps:$4 sm:$0xff]  }
 0x107   :  { %v3168_v3 = vsel %vm976_vm9, 1.0, %v2648_v62  ;;  %v573_v24 = vadd.f32 %v2037_v12, %v569_v17  ;;  %v2132_v25 = vsel %vm1181_vm13, 1.0, %v2648_v62  ;;  %vm1185_vm15 = vcmp.eq.s32.totalorder %v3008_v35, %v2735_v58 }
 0x108   :  { %1092 = vmatpush1.bf16.msra.mxu0 %v2380_v39  ;;  %vm980_vm0 = vcmp.eq.s32.totalorder %v3008_v35, %v2732_v57  ;;  %v2039_v4 = vsel %vm578_vm11, 1.0, %v2648_v62  ;;  %v1180_v27 = vadd.f32 %v2131_v53, %v1176_v9  ;;  %vm1189_vm1 = vcmp.eq.s32.totalorder %v3026_v46, %v2735_v58  ;;  %v2401_v39 = vld [vmem:[#allocation5 + $0x50] ss:$8 sps:$4 sm:$0xff]   ;;  %v2412_v9 = vld [vmem:[#allocation5 + $0x264] ss:$8 sps:$4 sm:$0xff]  }
 0x109   :  { %1093 = vmatprep.subr.bf16.mxu0 %v2388_v16  ;;  %481 = vmatpush1.bf16.msra.mxu1 %v2383_v14  ;;  %v577_v31 = vadd.f32 %v2038_v18, %v573_v24  ;;  %v2133_v32 = vsel %vm1185_vm15, 1.0, %v2648_v62  ;;  %v1377_v33 = vadd.f32 %v3089_v30, %v2969_v19  ;;  %v2162_v55 = vsel %vm1378_vm3, 1.0, %v2648_v62  ;;  %v2407_v18 = vld [vmem:[#allocation5 + $0x60] ss:$8 sps:$4 sm:$0xff]   ;;  %v2415_v24 = vld [vmem:[#allocation5 + $0x74] ss:$8 sps:$4 sm:$0xff]  }
 0x10a   :  { %482 = vmatprep.subr.bf16.mxu1 %v2391_v21  ;;  %v1184_v2 = vadd.f32 %v2132_v25, %v1180_v27  ;;  %vm1193_vm2 = vcmp.eq.s32.totalorder %v3042_v61, %v2735_v58  ;;  %vm1382_vm4 = vcmp.eq.s32.totalorder %v2996_v29, %v2738_v59  ;;  %vm1386_vm5 = vcmp.eq.s32.totalorder %v2979_v22, %v2738_v59  ;;  %v2404_v21 = vld [vmem:[#allocation5 + $0x250] ss:$8 sps:$4 sm:$0xff]  }
 0x10b   :  { %v3194_v36 = vadd.f32 %v2039_v4, %v577_v31  ;;  %v2134_v19 = vsel %vm1189_vm1, 1.0, %v2648_v62  ;;  %v1381_v30 = vadd.f32 %v2162_v55, %v1377_v33  ;;  %v2163_v38 = vsel %vm1382_vm4, 1.0, %v2648_v62  ;;  %v2418_v31 = vld [vmem:[#allocation5 + $0x274] ss:$8 sps:$4 sm:$0xff]  }
 0x10c   :  { %1094 = vmatpush1.bf16.msra.mxu0 %v2386_v26  ;;  %v1188_v41 = vadd.f32 %v2133_v32, %v1184_v2  ;;  %v2164_v42 = vsel %vm1386_vm5, 1.0, %v2648_v62  ;;  %vm1390_vm3 = vcmp.eq.s32.totalorder %v3008_v35, %v2738_v59  ;;  %vm1394_vm6 = vcmp.eq.s32.totalorder %v3026_v46, %v2738_v59  ;;  %v2416_v2 = vld [vmem:[#allocation5 + $0x270] ss:$8 sps:$4 sm:$0xff]  }
 0x10d   :  { %1095 = vmatprep.subr.bf16.mxu0 %v2394_v56  ;;  %483 = vmatpush1.bf16.msra.mxu1 %v2389_v28  ;;  %v975_v47 = vadd.f32 %v2099_v11, %v971_v10  ;;  %v2135_v15 = vsel %vm1193_vm2, 1.0, %v2648_v62  ;;  %v1385_v48 = vadd.f32 %v2163_v38, %v1381_v30  ;;  %vm1398_vm7 = vcmp.eq.s32.totalorder %v3042_v61, %v2738_v59  ;;  %v2406_v10 = vld [vmem:[#allocation5 + $0x254] ss:$8 sps:$4 sm:$0xff]   ;;  %v2410_v28 = vld [vmem:[#allocation5 + $0x260] ss:$8 sps:$4 sm:$0xff]  }
 0x10e   :  { %484 = vmatprep.subr.bf16.mxu1 %v2397_v37  ;;  %v1192_v50 = vadd.f32 %v2134_v19, %v1188_v41  ;;  %v2165_v54 = vsel %vm1390_vm3, 1.0, %v2648_v62  ;;  %v1582_v63 = vadd.f32 %v3101_v34, %v2987_v23  ;;  %v2194_v5 = vsel %vm1583_vm8, 1.0, %v2648_v62  ;;  %v2413_v56 = vld [vmem:[#allocation5 + $0x70] ss:$8 sps:$4 sm:$0xff]   ;;  %v2424_v19 = vld [vmem:[#allocation5 + $0x284] ss:$8 sps:$4 sm:$0xff]  }
 0x10f   :  { %v1389_v7 = vadd.f32 %v2164_v42, %v1385_v48  ;;  %v2166_v58 = vsel %vm1394_vm6, 1.0, %v2648_v62  ;;  %vm1587_vm9 = vcmp.eq.s32.totalorder %v2996_v29, %v2741_v60  ;;  %vm1591_vm10 = vcmp.eq.s32.totalorder %v2979_v22, %v2741_v60  ;;  %v2427_v38 = vld [vmem:[#allocation5 + $0x114] ss:$8 sps:$4 sm:$0xff]   ;;  %v2425_v42 = vld [vmem:[#allocation5 + $0x110] ss:$8 sps:$4 sm:$0xff]  }
 0x110   :  { %1096 = vmatpush1.bf16.msra.mxu0 %v2392_v40  ;;  %v3227_v23 = vadd.f32 %v2135_v15, %v1192_v50  ;;  %v1586_v34 = vadd.f32 %v2194_v5, %v1582_v63  ;;  %v2195_v6 = vsel %vm1587_vm9, 1.0, %v2648_v62  ;;  %vm1595_vm8 = vcmp.eq.s32.totalorder %v3008_v35, %v2741_v60  ;;  %v2422_v40 = vld [vmem:[#allocation5 + $0x280] ss:$8 sps:$4 sm:$0xff]   ;;  %v2436_v15 = vld [vmem:[#allocation5 + $0x2a4] ss:$8 sps:$4 sm:$0xff]  }
 0x111   :  { %1097 = vmatprep.subr.bf16.mxu0 %v2400_v45  ;;  %485 = vmatpush1.bf16.msra.mxu1 %v2395_v43  ;;  %v161_v29 = vadd.f32 %v3110_v44, %v3126_v0  ;;  %v1974_v22 = vsel %vm165_vm14, 1.0, %v2648_v62  ;;  %v1393_v11 = vadd.f32 %v2165_v54, %v1389_v7  ;;  %v2196_v12 = vsel %vm1591_vm10, 1.0, %v2648_v62  ;;  %v2433_v43 = vld [vmem:[#allocation5 + $0x124] ss:$8 sps:$4 sm:$0xff]   ;;  %v2428_v45 = vld [vmem:[#allocation5 + $0x290] ss:$8 sps:$4 sm:$0xff]  }
 0x112   :  { %486 = vmatprep.subr.bf16.mxu1 %v2403_v49  ;;  %v2101_v14 = vsel %vm980_vm0, 1.0, %v2648_v62  ;;  %v2167_v44 = vsel %vm1398_vm7, 1.0, %v2648_v62  ;;  %v1590_v0 = vadd.f32 %v2195_v6, %v1586_v34  ;;  %vm1599_vm11 = vcmp.eq.s32.totalorder %v3026_v46, %v2741_v60  ;;  %v2439_v48 = vld [vmem:[#allocation5 + $0x134] ss:$8 sps:$4 sm:$0xff]   ;;  %v2434_v49 = vld [vmem:[#allocation5 + $0x2a0] ss:$8 sps:$4 sm:$0xff]  }
 0x113   :  { %v979_v16 = vadd.f32 %v3168_v3, %v975_v47  ;;  %vm984_vm12 = vcmp.eq.s32.totalorder %v3026_v46, %v2732_v57  ;;  %v1397_v17 = vadd.f32 %v2166_v58, %v1393_v11  ;;  %v2197_v20 = vsel %vm1595_vm8, 1.0, %v2648_v62  ;;  %v2421_v46 = vld [vmem:[#allocation5 + $0x104] ss:$8 sps:$4 sm:$0xff]   ;;  %v2431_v47 = vld [vmem:[#allocation5 + $0x120] ss:$8 sps:$4 sm:$0xff]  }
 0x114   :  { %1098 = vmatpush1.bf16.msra.mxu0 %v2398_v8  ;;  %vm172_vm14 = vcmp.eq.s32.totalorder %v3042_v61, %v2720_v52  ;;  %v1594_v59 = vadd.f32 %v2196_v12, %v1590_v0  ;;  %vm1603_vm13 = vcmp.eq.s32.totalorder %v3042_v61, %v2741_v60  ;;  %v2198_v35 = vsel %vm1599_vm11, 1.0, %v2648_v62  ;;  %v2437_v50 = vld [vmem:[#allocation5 + $0x130] ss:$8 sps:$4 sm:$0xff]   ;;  %v2442_v54 = vld [vmem:[#allocation5 + $0x2b4] ss:$8 sps:$4 sm:$0xff]  }
 0x115   :  { %1099 = vmatprep.subr.bf16.mxu0 %v2406_v10  ;;  %487 = vmatpush1.bf16.msra.mxu1 %v2401_v39  ;;  %v983_v53 = vadd.f32 %v2101_v14, %v979_v16  ;;  %v3260_v3 = vadd.f32 %v2167_v44, %v1397_v17  ;;  %v168_v25 = vadd.f32 %v1974_v22, %v161_v29  ;;  %v2102_v52 = vsel %vm984_vm12, 1.0, %v2648_v62  ;;  %v2445_v63 = vld [vmem:[#allocation5 + $0x144] ss:$8 sps:$4 sm:$0xff]   ;;  %v2440_v5 = vld [vmem:[#allocation5 + $0x2b0] ss:$8 sps:$4 sm:$0xff]  }
 0x116   :  { %488 = vmatprep.subr.bf16.mxu1 %v2409_v13  ;;  %v1598_v26 = vadd.f32 %v2197_v20, %v1594_v59  ;;  %v1975_v4 = vsel %vm172_vm14, 1.0, %v2648_v62  ;;  %vm988_vm15 = vcmp.eq.s32.totalorder %v3042_v61, %v2732_v57  ;;  %v2199_v27 = vsel %vm1603_vm13, 1.0, %v2648_v62  ;;  %v2419_v57 = vld [vmem:[#allocation5 + $0x100] ss:$8 sps:$4 sm:$0xff]   ;;  %v2448_v58 = vld [vmem:[#allocation5 + $0x2c4] ss:$8 sps:$4 sm:$0xff]  }
 0x117   :  { %v987_v32 = vadd.f32 %v2102_v52, %v983_v53  ;;  %v175_v33 = vadd.f32 %v1975_v4, %v168_v25  ;;  %v2103_v55 = vsel %vm988_vm15, 1.0, %v2648_v62  ;;  %v2430_v62 = vld [vmem:[#allocation5 + $0x294] ss:$8 sps:$4 sm:$0xff]   ;;  %v2443_v7 = vld [vmem:[#allocation5 + $0x140] ss:$8 sps:$4 sm:$0xff]   ;;  %v582_v17 = vpack.c.bf16 %v3194_v36, %v3194_v36 }
 0x118   :  { %1100 = vmatpush1.bf16.msra.mxu0 %v2404_v21  ;;  %v1602_v60 = vadd.f32 %v2198_v35, %v1598_v26  ;;  %v2451_v8 = vld [vmem:[#allocation5 + $0x154] ss:$8 sps:$4 sm:$0xff]   ;;  %v2446_v34 = vld [vmem:[#allocation5 + $0x2c0] ss:$8 sps:$4 sm:$0xff]   ;;  %v2449_v6 = vld [vmem:[#allocation5 + $0x150] ss:$8 sps:$4 sm:$0xff]   ;;  %v1197_v21 = vpack.c.bf16 %v3227_v23, %v3227_v23 }
 0x119   :  { %1101 = vmatprep.subr.bf16.mxu0 %v2412_v9  ;;  %489 = vmatpush1.bf16.msra.mxu1 %v2407_v18  ;;  %v991_v61 = vadd.f32 %v2103_v55, %v987_v32  ;;  %v176_v30 = vpack.c.bf16 %v175_v33, %v175_v33  ;;  %v2454_v39 = vld [vmem:[#allocation5 + $0x2d4] ss:$8 sps:$4 sm:$0xff]   ;;  %v2457_v10 = vld [vmem:[#allocation5 + $0x164] ss:$8 sps:$4 sm:$0xff]   ;;  %v2452_v29 = vld [vmem:[#allocation5 + $0x2d0] ss:$8 sps:$4 sm:$0xff]  }
 0x11a   :  { %490 = vmatprep.subr.bf16.mxu1 %v2415_v24  ;;  %v3275_v37 = vadd.f32 %v2199_v27, %v1602_v60  ;;  %v2455_v22 = vld [vmem:[#allocation5 + $0x160] ss:$8 sps:$4 sm:$0xff]   ;;  %v2460_v11 = vld [vmem:[#allocation5 + $0x2e4] ss:$8 sps:$4 sm:$0xff]   ;;  %v2463_v12 = vld [vmem:[#allocation5 + $0x174] ss:$8 sps:$4 sm:$0xff]  }
 0x11b   :  { %v992_v41 = vpack.c.bf16 %v991_v61, %v991_v61  ;;  %v2458_v13 = vld [vmem:[#allocation5 + $0x2e0] ss:$8 sps:$4 sm:$0xff]   ;;  %v2461_v14 = vld [vmem:[#allocation5 + $0x170] ss:$8 sps:$4 sm:$0xff]   ;;  %v2466_v44 = vld [vmem:[#allocation5 + $0x2f4] ss:$8 sps:$4 sm:$0xff]  }
 0x11c   :  { %1102 = vmatpush1.bf16.msra.mxu0 %v2410_v28  ;;  %v2464_v0 = vld [vmem:[#allocation5 + $0x2f0] ss:$8 sps:$4 sm:$0xff]   ;;  %v2469_v16 = vld [vmem:[#allocation5 + $0x304] ss:$8 sps:$4 sm:$0xff]   ;;  %v2467_v20 = vld [vmem:[#allocation5 + $0x300] ss:$8 sps:$4 sm:$0xff]  }
 0x11d   :  { %1103 = vmatprep.subr.bf16.mxu0 %v2418_v31  ;;  %491 = vmatpush1.bf16.msra.mxu1 %v2413_v56  ;;  %v2472_v59 = vld [vmem:[#allocation5 + $0x314] ss:$8 sps:$4 sm:$0xff]   ;;  %v2470_v18 = vld [vmem:[#allocation5 + $0x310] ss:$8 sps:$4 sm:$0xff]   ;;  %v2475_v9 = vld [vmem:[#allocation5 + $0x324] ss:$8 sps:$4 sm:$0xff]   ;;  %v1402_v31 = vpack.c.bf16 %v3260_v3, %v3260_v3 }
 0x11e   :  { %679 = vmatprep.subr.bf16.mxu1 %v2421_v46  ;;  %v2473_v53 = vld [vmem:[#allocation5 + $0x320] ss:$8 sps:$4 sm:$0xff]   ;;  %v2478_v35 = vld [vmem:[#allocation5 + $0x334] ss:$8 sps:$4 sm:$0xff]   ;;  %v2476_v36 = vld [vmem:[#allocation5 + $0x330] ss:$8 sps:$4 sm:$0xff]  }
 0x11f   :  { %v2481_v24 = vld [vmem:[#allocation5 + $0x344] ss:$8 sps:$4 sm:$0xff]   ;;  %v2479_v25 = vld [vmem:[#allocation5 + $0x340] ss:$8 sps:$4 sm:$0xff]   ;;  %v2484_v23 = vld [vmem:[#allocation5 + $0x354] ss:$8 sps:$4 sm:$0xff]  }
 0x120   :  { %1104 = vmatpush1.bf16.msra.mxu0 %v2416_v2  ;;  %509 = vmatmul.mubr.bf16.vlgmr.msra.gmra.mrb[0].mxu1 %v176_v30  ;;  %v2482_v52 = vld [vmem:[#allocation5 + $0x350] ss:$8 sps:$4 sm:$0xff]   ;;  %v2487_v26 = vld [vmem:[#allocation5 + $0x364] ss:$8 sps:$4 sm:$0xff]   ;;  %v2485_v4 = vld [vmem:[#allocation5 + $0x360] ss:$8 sps:$4 sm:$0xff]  }
 0x121   :  { %1294 = vmatprep.subr.bf16.mxu0 %v2424_v19  ;;  %680 = vmatpush1.bf16.msra.mxu1 %v2419_v57  ;;  %v2490_v27 = vld [vmem:[#allocation5 + $0x374] ss:$8 sps:$4 sm:$0xff]   ;;  %v2488_v28 = vld [vmem:[#allocation5 + $0x370] ss:$8 sps:$4 sm:$0xff]   ;;  %v2493_v60 = vld [vmem:[#allocation5 + $0x384] ss:$8 sps:$4 sm:$0xff]  }
 0x122   :  { %681 = vmatprep.subr.bf16.mxu1 %v2427_v38  ;;  %711 = vmatprep.mubr.bf16.mxu1 %v2633_v1  ;;  %v2491_v56 = vld [vmem:[#allocation5 + $0x380] ss:$8 sps:$4 sm:$0xff]   ;;  %v2496_v32 = vld [vmem:[#allocation5 + $0x394] ss:$8 sps:$4 sm:$0xff]   ;;  %v2494_v33 = vld [vmem:[#allocation5 + $0x390] ss:$8 sps:$4 sm:$0xff]  }
 0x123   :  { %1122 = vmatmul.mubr.bf16.vlgmr.msra.gmra.mrb[0].mxu0 %v992_v41  ;;  %v2499_v46 = vld [vmem:[#allocation5 + $0x3a4] ss:$8 sps:$4 sm:$0xff]   ;;  %v2497_v55 = vld [vmem:[#allocation5 + $0x3a0] ss:$8 sps:$4 sm:$0xff]   ;;  %v2502_v2 = vld [vmem:[#allocation5 + $0x3b4] ss:$8 sps:$4 sm:$0xff]  }
 0x124   :  { %1295 = vmatpush1.bf16.msra.mxu0 %v2422_v40  ;;  %1326 = vmatprep.mubr.bf16.mxu0 %v2633_v1  ;;  %v2500_v57 = vld [vmem:[#allocation5 + $0x3b0] ss:$8 sps:$4 sm:$0xff]   ;;  %v2505_v61 = vld [vmem:[#allocation5 + $0x3c4] ss:$8 sps:$4 sm:$0xff]   ;;  %v2503_v19 = vld [vmem:[#allocation5 + $0x3c0] ss:$8 sps:$4 sm:$0xff]  }
 0x125   :  { %1296 = vmatprep.subr.bf16.mxu0 %v2430_v62  ;;  %682 = vmatpush1.bf16.msra.mxu1 %v2425_v42  ;;  %v2508_v3 = vld [vmem:[#allocation5 + $0x3d4] ss:$8 sps:$4 sm:$0xff]   ;;  %v2506_v30 = vld [vmem:[#allocation5 + $0x3d0] ss:$8 sps:$4 sm:$0xff]   ;;  %v2511_v38 = vld [vmem:[#allocation5 + $0x3e4] ss:$8 sps:$4 sm:$0xff]   ;;  %v1607_v42 = vpack.c.bf16 %v3275_v37, %v3275_v37 }
 0x126   :  { %683 = vmatprep.subr.bf16.mxu1 %v2433_v43  ;;  %v2514_v40 = vld [vmem:[#allocation5 + $0x3f4] ss:$8 sps:$4 sm:$0xff]   ;;  %v2512_v41 = vld [vmem:[#allocation5 + $0x3f0] ss:$8 sps:$4 sm:$0xff]   ;;  %v2515_v62 = vld [vmem:[#allocation7 + $0x40] sm:$0xff]  }
 0x127   :  { %v2516_v43 = vld [vmem:[#allocation7] sm:$0xff]   ;;  %v2525_v37 = vld [vmem:[#allocation7 + $0x68] sm:$0xff]  }
 0x128   :  { %1297 = vmatpush1.bf16.msra.mxu0 %v2428_v45  ;;  %v2517_v45 = vld [vmem:[#allocation7 + $0x48] sm:$0xff]  }
 0x129   :  { %1298 = vmatprep.subr.bf16.mxu0 %v2436_v15  ;;  %684 = vmatpush1.bf16.msra.mxu1 %v2431_v47  ;;  %v2518_v47 = vld [vmem:[#allocation7 + $0x8] sm:$0xff]   ;;  %v2519_v15 = vld [vmem:[#allocation7 + $0x50] sm:$0xff]  }
 0x12a   :  { %685 = vmatprep.subr.bf16.mxu1 %v2439_v48  ;;  %v2520_v48 = vld [vmem:[#allocation7 + $0x10] sm:$0xff]  }
 0x12c   :  { %1299 = vmatpush1.bf16.msra.mxu0 %v2434_v49  ;;  %v2521_v49 = vld [vmem:[#allocation7 + $0x58] sm:$0xff]  }
 0x12d   :  { %1300 = vmatprep.subr.bf16.mxu0 %v2442_v54  ;;  %686 = vmatpush1.bf16.msra.mxu1 %v2437_v50  ;;  %v2522_v50 = vld [vmem:[#allocation7 + $0x18] sm:$0xff]   ;;  %v2523_v54 = vld [vmem:[#allocation7 + $0x60] sm:$0xff]  }
 0x12e   :  { %687 = vmatprep.subr.bf16.mxu1 %v2445_v63  ;;  %v2524_v63 = vld [vmem:[#allocation7 + $0x20] sm:$0xff]  }
 0x130   :  { %1301 = vmatpush1.bf16.msra.mxu0 %v2440_v5  ;;  %v2526_v5 = vld [vmem:[#allocation7 + $0x28] sm:$0xff]  }
 0x131   :  { %1302 = vmatprep.subr.bf16.mxu0 %v2448_v58  ;;  %688 = vmatpush1.bf16.msra.mxu1 %v2443_v7  ;;  %v2527_v7 = vld [vmem:[#allocation7 + $0x70] sm:$0xff]  }
 0x132   :  { %689 = vmatprep.subr.bf16.mxu1 %v2451_v8  ;;  %v2528_v58 = vld [vmem:[#allocation7 + $0x30] sm:$0xff]   ;;  %v2529_v8 = vld [vmem:[#allocation7 + $0x78] sm:$0xff]  }
 0x134   :  { %1303 = vmatpush1.bf16.msra.mxu0 %v2446_v34  ;;  %v2530_v34 = vld [vmem:[#allocation7 + $0x38] sm:$0xff]  }
 0x135   :  { %1304 = vmatprep.subr.bf16.mxu0 %v2454_v39  ;;  %690 = vmatpush1.bf16.msra.mxu1 %v2449_v6 }
 0x136   :  { %691 = vmatprep.subr.bf16.mxu1 %v2457_v10 }
 0x138   :  { %1305 = vmatpush1.bf16.msra.mxu0 %v2452_v29 }
 0x139   :  { %1306 = vmatprep.subr.bf16.mxu0 %v2460_v11  ;;  %692 = vmatpush1.bf16.msra.mxu1 %v2455_v22  ;;  %v1752_v22 = vshrl.u32 %v62_v51, 7 }
 0x13a   :  { %693 = vmatprep.subr.bf16.mxu1 %v2463_v12  ;;  %v1749_v12 = vld [vmem:[%s3310_s2] sm:$0x3] }
 0x13b   :  { %v1753_v11 = vsub.s32 0, %v1752_v22 }
 0x13c   :  { %1307 = vmatpush1.bf16.msra.mxu0 %v2458_v13  ;;  %v1757_v13 = vsub.s32 1, %v1752_v22 }
 0x13d   :  { %1308 = vmatprep.subr.bf16.mxu0 %v2466_v44  ;;  %694 = vmatpush1.bf16.msra.mxu1 %v2461_v14 }
 0x13e   :  { %2233 = vmatprep.subr.bf16.mxu1 %v2515_v62 }
 0x140   :  { %1309 = vmatpush1.bf16.msra.mxu0 %v2464_v0  ;;  %712 = vmatmul.mubr.bf16.vlgmr.msra.gmra.mrb[0].mxu1 %v582_v17  ;;  %v1754_v0 = vrot.slane %v1749_v12, %v1753_v11 }
 0x141   :  { %1499 = vmatprep.subr.bf16.mxu0 %v2469_v16  ;;  %2234 = vmatpush3.bf16.msra.mxu1 %v2516_v43 }
 0x142   :  { %2235 = vmatprep.subr.bf16.mxu1 %v2517_v45 }
 0x143   :  { %1327 = vmatmul.mubr.bf16.vlgmr.msra.gmra.mrb[0].mxu0 %v1197_v21 }
 0x144   :  { %1500 = vmatpush1.bf16.msra.mxu0 %v2467_v20  ;;  %1531 = vmatprep.mubr.bf16.mxu0 %v2633_v1  ;;  %v1758_v20 = vrot.slane %v1749_v12, %v1757_v13 }
 0x145   :  { %1501 = vmatprep.subr.bf16.mxu0 %v2472_v59  ;;  %2236 = vmatpush3.bf16.msra.mxu1 %v2518_v47 }
 0x146   :  { %2237 = vmatprep.subr.bf16.mxu1 %v2519_v15 }
 0x148   :  { %1502 = vmatpush1.bf16.msra.mxu0 %v2470_v18 }
 0x149   :  { %1503 = vmatprep.subr.bf16.mxu0 %v2475_v9  ;;  %2238 = vmatpush3.bf16.msra.mxu1 %v2520_v48 }
 0x14a   :  { %2239 = vmatprep.subr.bf16.mxu1 %v2521_v49 }
 0x14c   :  { %1504 = vmatpush1.bf16.msra.mxu0 %v2473_v53 }
 0x14d   :  { %1505 = vmatprep.subr.bf16.mxu0 %v2478_v35  ;;  %2240 = vmatpush3.bf16.msra.mxu1 %v2522_v50 }
 0x14e   :  { %2241 = vmatprep.subr.bf16.mxu1 %v2523_v54 }
 0x150   :  { %1506 = vmatpush1.bf16.msra.mxu0 %v2476_v36 }
 0x151   :  { %1507 = vmatprep.subr.bf16.mxu0 %v2481_v24  ;;  %2242 = vmatpush3.bf16.msra.mxu1 %v2524_v63 }
 0x152   :  { %2243 = vmatprep.subr.bf16.mxu1 %v2525_v37 }
 0x154   :  { %1508 = vmatpush1.bf16.msra.mxu0 %v2479_v25 }
 0x155   :  { %1509 = vmatprep.subr.bf16.mxu0 %v2484_v23  ;;  %2244 = vmatpush3.bf16.msra.mxu1 %v2526_v5 }
 0x156   :  { %2245 = vmatprep.subr.bf16.mxu1 %v2527_v7 }
 0x158   :  { %1510 = vmatpush1.bf16.msra.mxu0 %v2482_v52  ;;  %v2216_v52 = vld [vmem:[%s3312_s4] ss:$0 sm:$0xff] }
 0x159   :  { %1511 = vmatprep.subr.bf16.mxu0 %v2487_v26  ;;  %2246 = vmatpush3.bf16.msra.mxu1 %v2528_v58 }
 0x15a   :  { %2247 = vmatprep.subr.bf16.mxu1 %v2529_v8 }
 0x15c   :  { %1512 = vmatpush1.bf16.msra.mxu0 %v2485_v4 }
 0x15d   :  { %1513 = vmatprep.subr.bf16.mxu0 %v2490_v27  ;;  %2248 = vmatpush3.bf16.msra.mxu1 %v2530_v34 }
 0x160   :  { %1514 = vmatpush1.bf16.msra.mxu0 %v2488_v28 }
 0x161   :  { %1704 = vmatprep.subr.bf16.mxu0 %v2493_v60 }
 0x163   :  { %1532 = vmatmul.mubr.bf16.vlgmr.msra.gmra.mrb[0].mxu0 %v1402_v31 }
 0x164   :  { %1705 = vmatpush1.bf16.msra.mxu0 %v2491_v56  ;;  %1736 = vmatprep.mubr.bf16.mxu0 %v2633_v1  ;;  %v2509_v1 = vld [vmem:[#allocation5 + $0x3e0] ss:$8 sps:$4 sm:$0xff]  }
 0x165   :  { %1706 = vmatprep.subr.bf16.mxu0 %v2496_v32 }
 0x168   :  { %1707 = vmatpush1.bf16.msra.mxu0 %v2494_v33 }
 0x169   :  { %1708 = vmatprep.subr.bf16.mxu0 %v2499_v46 }
 0x16c   :  { %1709 = vmatpush1.bf16.msra.mxu0 %v2497_v55 }
 0x16d   :  { %1710 = vmatprep.subr.bf16.mxu0 %v2502_v2 }
 0x170   :  { %1711 = vmatpush1.bf16.msra.mxu0 %v2500_v57 }
 0x171   :  { %1712 = vmatprep.subr.bf16.mxu0 %v2505_v61 }
 0x174   :  { %1713 = vmatpush1.bf16.msra.mxu0 %v2503_v19 }
 0x175   :  { %1714 = vmatprep.subr.bf16.mxu0 %v2508_v3 }
 0x178   :  { %1715 = vmatpush1.bf16.msra.mxu0 %v2506_v30 }
 0x179   :  { %1716 = vmatprep.subr.bf16.mxu0 %v2511_v38 }
 0x17c   :  { %1717 = vmatpush1.bf16.msra.mxu0 %v2509_v1 }
 0x17d   :  { %1718 = vmatprep.subr.bf16.mxu0 %v2514_v40 }
 0x180   :  { %1719 = vmatpush1.bf16.msra.mxu0 %v2512_v41 }
 0x183   :  { %1737 = vmatmul.mubr.bf16.vlgmr.msra.gmra.mrb[0].mxu0 %v1607_v42 }
 0x213   :  { %v713_v6 = vpop.f32.mrb[0].mxu1 }
 0x214   :  { %v715_v39 = vpop.f32.mrb[1].mxu1 }
 0x215   :  { %v717_v10 = vpop.f32.mrb[2].mxu1 }
 0x216   :  { %v718_v29 = vpop.f32.mrb[3].mxu1 }
 0x256   :  { %v1738_v14 = vpop.f32.mrb[0].mxu0 }
 0x257   :  { %v2255_v44 = vadd.f32 %v1738_v14, %v713_v6  ;;  %v1740_v16 = vpop.f32.mrb[1].mxu0 }
 0x258   :  { %v2256_v17 = vadd.f32 %v1740_v16, %v715_v39  ;;  %v1742_v21 = vpop.f32.mrb[2].mxu0 }
 0x259   :  { %v1747_v59 = vmul.f32 0.0625, %v2255_v44  ;;  %v1743_v18 = vpop.f32.mrb[3].mxu0 }
 0x25a   :  { %v1748_v9 = vmul.f32 0.0625, %v2256_v17 }
 0x25b   :  { %v1761_v53 = vadd.f32 %v1754_v0, %v1747_v59 }
 0x25c   :  { %v1762_v35 = vadd.f32 %v1758_v20, %v1748_v9 }
 0x25d   :  { %v1763_v36 = vmax.f32 %v1761_v53, 0.0 }
 0x25e   :  { %v1764_v51 = vmax.f32 %v1762_v35, 0.0 }
 0x25f   :  { %v1765_v25 = vpack.c.bf16 %v1763_v36, %v1763_v36 }
 0x260   :  { %v1766_v24 = vpack.c.bf16 %v1764_v51, %v1764_v51 }
 0x262   :  { %1934 = vmatprep.mubr.bf16.mxu1 %v1766_v24 }
 0x263   :  { %1935 = vmatmul.mubr.bf16.vlgmr.msra.gmra.mrb[4].mxu1 %v1765_v25 }
 0x336   :  { %v2249_v23 = vpop.f32.mrb[4].mxu1 }
 0x337   :  { %v2250_v26 = vpop.f32.mrb[5].mxu1 }
 0x338   :  { %v2251_v4 = vadd.f32 %v2250_v26, %v2249_v23  ;;  %v2252_v27 = vpop.f32.mrb[6].mxu1 }
 0x339   :  { %v2253_v28 = vpop.f32.mrb[7].mxu1 }
 0x33a   :  { %v1937_v60 = vadd.f32 %v2251_v4, %v2216_v52 }
 0x33c   :  { %v1942_v56 = vmax.f32 %v1937_v60, 0.0 }
 0x33e   :  { %1943 = vst [vmem:[#allocation8] sm:$0xff] %v1942_v56 }
 0x33f   :  { %2608 = shalt.err (!%p2605_p0)
}
 0x340   :  { %s2609_s4 = scalar_lea.hbm %s3313_s5, 128 }
 0x341   :  { %p2610_p1 = scmp.ne.s32.totalorder %s3313_s5, %s2609_s4  ;;  %p2613_p2 = scmp.lt.u32.totalorder %s2609_s4, %s3313_s5 }
 0x343   :  { %p2615_p3 = pnand %p2613_p2, %p2610_p1 }
 0x345   :  { %2618 = shalt.err (!%p2615_p3)
}
 0x346   :  { %1953 = dma.vmem_to_hbm [thread:$0]  %s1951_s9, 128, %s3313_s5, [#allocation4]  }
 0x347   :  { %2623 = dma.done.wait [#allocation4], 128  }
 0x348   :  { %2624 = vsyncadd [#allocation4], 4294967168 }
 0x349   :  { %1957 = vsyncpa [#allocation3], 1 }
 0x34a   :  { %1958 = vsyncpa [#allocation6], 1 }
 0x34b   :  { %1959 = vsyncpa [#allocation4], 1 }

</bundles_post_ra>
